<compile_context>
chip_gen: v6e
topology: v6e:2x2x1
jax: 0.10.0
libtpu: 0.0.40
codegen_flags: <defaults>
</compile_context>

<pallas_src>
import numpy as np
import jax
import jax.numpy as jnp
from jax.experimental import pallas as pl
from jax.experimental.pallas import tpu as pltpu

# ---------------- PreprocessorConfig defaults ----------------
SAMPLE_RATE = 16000
FRAME_SIZE_MS = 25
FRAME_STEP_MS = 10
PREEMPH = 0.97                    # preemph_htk_flavor = True
NUM_BINS = 80
LOWER_EDGE_HERTZ = 125.0
UPPER_EDGE_HERTZ = 7600.0
OUTPUT_FLOOR = 1e-5
INPUT_SCALE = 2.0 ** (-15)        # use_divide_stream = True

FRAME_STEP = int(round(SAMPLE_RATE * FRAME_STEP_MS / 1000.0))       # 160
FRAME_SIZE = int(round(SAMPLE_RATE * FRAME_SIZE_MS / 1000.0)) + 1   # 401
FFT_SIZE = int(2 ** np.ceil(np.log2(FRAME_SIZE)))                   # 512
NUM_SPEC_BINS = FFT_SIZE // 2 + 1                                   # 257
WIN_LEN = FRAME_SIZE - 1                                            # 400

PAD_MEL = 128                     # 80 mel bins padded to 128 lanes


# ---------------- deterministic constant "parameters" ----------------
def _linear_to_mel_weight_matrix_np(num_mel_bins, num_spectrogram_bins,
                                    sample_rate, lower_edge_hertz,
                                    upper_edge_hertz):
    def hz_to_mel(f):
        return 1127.0 * np.log(1.0 + f / 700.0)

    bands_to_zero = 1
    nyquist = sample_rate / 2.0
    linear_freqs = np.linspace(0.0, nyquist, num_spectrogram_bins)[bands_to_zero:]
    spec_mel = hz_to_mel(linear_freqs)[:, None]
    edges = np.linspace(hz_to_mel(lower_edge_hertz), hz_to_mel(upper_edge_hertz),
                        num_mel_bins + 2)
    lower = edges[:-2][None, :]
    center = edges[1:-1][None, :]
    upper = edges[2:][None, :]
    lower_slopes = (spec_mel - lower) / (center - lower)
    upper_slopes = (upper - spec_mel) / (upper - center)
    w = np.clip(np.minimum(lower_slopes, upper_slopes), 0.0, None)
    w = np.pad(w, ((bands_to_zero, 0), (0, 0)))
    return w.astype(np.float32)                                      # (257, 80)


def _make_constants():
    # Hann window, periodic (win length 400 is even) == torch.hann_window(400, True).
    n = np.arange(WIN_LEN, dtype=np.float64)
    window = 0.5 - 0.5 * np.cos(2.0 * np.pi * n / WIN_LEN)           # (400,)

    # HTK-flavor pre-emphasis as a linear map P: frame(401) -> pre(400)
    #   y[0] = (1 - p) * x[0];  y[i] = x[i] - p * x[i-1], i = 1..399  (x[400] unused)
    P = np.zeros((WIN_LEN, FRAME_SIZE), np.float64)                  # (400, 401)
    P[0, 0] = 1.0 - PREEMPH
    rows = np.arange(1, WIN_LEN)
    P[rows, rows] = 1.0
    P[rows, rows - 1] = -PREEMPH

    mel_full = _linear_to_mel_weight_matrix_np(
        NUM_BINS, NUM_SPEC_BINS, SAMPLE_RATE, LOWER_EDGE_HERTZ, UPPER_EDGE_HERTZ)

    # Drop spectrum bins with exactly zero mel weight (bin 0, <125 Hz, >7600 Hz).
    # Exact: the dropped bins contribute nothing to the mel projection.
    nz_rows = np.where(np.any(mel_full != 0.0, axis=1))[0]
    k_lo, k_hi = int(nz_rows[0]), int(nz_rows[-1])
    keep = np.arange(k_lo, k_hi + 1)                                 # ~239 bins
    num_keep = keep.size
    pad_spec = ((num_keep + 127) // 128) * 128                       # 256
    assert num_keep <= pad_spec

    # Real-DFT of the zero-padded (400 -> 512) windowed frame, kept bins only:
    #   |X[k]|^2 = (xw @ cos_k)^2 + (xw @ sin_k)^2
    t = np.arange(WIN_LEN, dtype=np.float64)[:, None]
    k = keep.astype(np.float64)[None, :]
    ang = 2.0 * np.pi * t * k / FFT_SIZE
    cos_m = np.cos(ang)                                              # (400, num_keep)
    sin_m = np.sin(ang)

    # Fold pre-emphasis + window into the DFT matrices: frame(401) @ M -> re / im.
    cos_c = P.T @ (window[:, None] * cos_m)                          # (401, num_keep)
    sin_c = P.T @ (window[:, None] * sin_m)

    # Lane-align: cos padded to pad_spec | sin padded to pad_spec -> (401, 2*pad_spec).
    cs = np.zeros((FRAME_SIZE, 2 * pad_spec), np.float64)
    cs[:, :num_keep] = cos_c
    cs[:, pad_spec:pad_spec + num_keep] = sin_c
    cs = cs.astype(np.float32)                                       # (401, 512)

    mel_pad = np.zeros((pad_spec, PAD_MEL), np.float32)              # (256, 128)
    mel_pad[:num_keep, :NUM_BINS] = mel_full[keep]

    # per_bin_mean=None / per_bin_stddev=None  ->  0 / 1 (inv-std precomputed).
    mean = np.zeros((1, PAD_MEL), np.float32)
    invstd = np.ones((1, PAD_MEL), np.float32)
    return cs, mel_pad, mean, invstd, window.astype(np.float32), mel_full, pad_spec


_CS, _MEL_PAD, _MEAN, _INVSTD, _WINDOW, _MEL_REF, PAD_SPEC = _make_constants()


# ---------------- Pallas kernel: frames -> DFT -> power -> mel -> log-norm ----------
def _melfb_kernel(x_ref, cs_ref, mel_ref, mean_ref, invstd_ref, o_ref):
    x = x_ref[...]                                                   # (tile, 401) f32
    # bf16_3x (== Precision.HIGH) real-DFT: split LHS into hi/lo bf16 halves and
    # use pre-split hi/lo bf16 constants; 3 single-pass MXU matmuls written as a
    # direct accumulation chain (MRB in-place accumulation on v7x).
    x_hi = x.astype(jnp.bfloat16)
    x_lo = (x - x_hi.astype(jnp.float32)).astype(jnp.bfloat16)
    cs_hi = cs_ref[0]                                                # (401, 512) bf16
    cs_lo = cs_ref[1]                                                # (401, 512) bf16
    y = jnp.dot(x_hi, cs_hi, preferred_element_type=jnp.float32)
    y = y + jnp.dot(x_lo, cs_hi, preferred_element_type=jnp.float32)
    y = y + jnp.dot(x_hi, cs_lo, preferred_element_type=jnp.float32)  # (tile, 512)

    re = y[:, :PAD_SPEC]                                             # lane-aligned slices
    im = y[:, PAD_SPEC:]
    power = re * re + im * im                                        # (tile, 256) f32

    # Mel projection: single bf16 MXU pass, f32 accumulation.
    mel = jnp.dot(power.astype(jnp.bfloat16), mel_ref[...],
                  preferred_element_type=jnp.float32)                # (tile, 128)
    logmel = jnp.log(jnp.maximum(mel, OUTPUT_FLOOR))
    o_ref[...] = (logmel - mean_ref[...]) * invstd_ref[...]


def _max_tile_rows():
    # Chip-aware cap: v6e/v7x have fast MXUs (per-step compute ~1-1.5 us at tile
    # 512, so step overhead matters) and enough VMEM for 1024-row tiles.
    # v5e / older: keep 512 (fits the 16 MiB default scoped VMEM; per-step
    # compute is already ~7 us so overhead is <5%).
    try:
        kind = jax.devices()[0].device_kind.lower()
    except Exception:
        kind = ""
    if ("v6" in kind) or ("v7" in kind) or ("7x" in kind):
        return 1024
    return 512


def _choose_tile_n(n_rows):
    # Largest allowed row tile that still leaves >= 4 grid steps (>= 2 per
    # TensorCore on v7x so both cores pipeline under dimension_semantics).
    cap = _max_tile_rows()
    for t in (1024, 512, 256, 128, 64, 32, 16, 8):
        if t <= cap and n_rows >= 4 * t:
            return t
    return 8


def _melfb_pallas(framed):
    """framed: (N, 401) float32 raw frames -> (N, 80) normalized log-mel."""
    N = framed.shape[0]
    tile_n = _choose_tile_n(N)
    n_pad = (-N) % tile_n
    if n_pad:
        framed = jnp.pad(framed, ((0, n_pad), (0, 0)))
    Np = framed.shape[0]

    # Constant operands (folded + padded); hi/lo bf16 split packed into ONE
    # (2, 401, 512) operand so only a single constant DMA stream is pipelined.
    cs32 = jnp.asarray(_CS)
    cs_hi = cs32.astype(jnp.bfloat16)
    cs_lo = (cs32 - cs_hi.astype(jnp.float32)).astype(jnp.bfloat16)
    cs_hilo = jnp.stack([cs_hi, cs_lo], axis=0)                      # (2, 401, 512)
    mel_bf = jnp.asarray(_MEL_PAD).astype(jnp.bfloat16)              # (256, 128)
    mean = jnp.asarray(_MEAN)
    invstd = jnp.asarray(_INVSTD)

    # VMEM budget @ tile 1024: frames 2x1.57 MiB + cs 2x0.78 MiB + out 2x0.5 MiB
    # + mel/mean/invstd + ~8 MiB f32 temporaries  ->  well under 48 MiB.
    cp_kwargs = dict(dimension_semantics=("parallel",))
    if tile_n >= 1024:
        cp_kwargs["vmem_limit_bytes"] = 48 * 1024 * 1024

    out = pl.pallas_call(
        _melfb_kernel,
        out_shape=jax.ShapeDtypeStruct((Np, PAD_MEL), jnp.float32),
        grid_spec=pltpu.PrefetchScalarGridSpec(
            num_scalar_prefetch=0,
            grid=(Np // tile_n,),
            in_specs=[
                pl.BlockSpec((tile_n, FRAME_SIZE), lambda i: (i, 0)),          # frames
                pl.BlockSpec((2, FRAME_SIZE, 2 * PAD_SPEC), lambda i: (0, 0, 0)),  # cos|sin hi/lo
                pl.BlockSpec((PAD_SPEC, PAD_MEL), lambda i: (0, 0)),            # mel
                pl.BlockSpec((1, PAD_MEL), lambda i: (0, 0)),                   # mean
                pl.BlockSpec((1, PAD_MEL), lambda i: (0, 0)),                   # 1/std
            ],
            out_specs=pl.BlockSpec((tile_n, PAD_MEL), lambda i: (i, 0)),
        ),
        compiler_params=pltpu.CompilerParams(**cp_kwargs),
    )(framed, cs_hilo, mel_bf, mean, invstd)
    # Drop row padding and the padded mel lanes (cols 80..127 hold log(floor)).
    return out[:N, :NUM_BINS]


# ---------------- full forward (glue in plain JAX + Pallas hot path) ----------------
def _frame_signal(inputs, input_paddings):
    B, T = inputs.shape
    pcm = inputs * (1.0 - input_paddings) * INPUT_SCALE
    num_frames = (T - FRAME_SIZE) // FRAME_STEP + 1                  # pad_end=False
    idx = (jnp.arange(num_frames)[:, None] * FRAME_STEP
           + jnp.arange(FRAME_SIZE)[None, :])
    framed = pcm[:, idx]                                             # (B, nf, 401)
    out_paddings = jnp.min(input_paddings[:, idx], axis=2)           # (B, nf)
    return framed, out_paddings, num_frames


def mel_filterbank_frontend(inputs, input_paddings):
    """inputs: (B, T) float32 audio; input_paddings: (B, T) {0,1}."""
    B, T = inputs.shape
    framed, out_paddings, num_frames = _frame_signal(inputs, input_paddings)
    x = framed.reshape(B * num_frames, FRAME_SIZE)
    out = _melfb_pallas(x)
    return out.reshape(B, num_frames, NUM_BINS), out_paddings


# ---------------- pure-JAX reference (uses jnp.fft.rfft) for verification -----------
def reference_forward(inputs, input_paddings):
    framed, out_paddings, _ = _frame_signal(inputs, input_paddings)
    pre = jnp.concatenate(
        [framed[:, :, :1] * (1.0 - PREEMPH),
         framed[:, :, 1:-1] - PREEMPH * framed[:, :, :-2]], axis=2)   # HTK pre-emphasis
    windowed = pre * jnp.asarray(_WINDOW)[None, None, :]
    spectrum = jnp.fft.rfft(windowed, FFT_SIZE, axis=2)
    power = jnp.abs(spectrum) ** 2.0                                  # compute_energy
    mel = jnp.einsum('fn,btf->btn', jnp.asarray(_MEL_REF), power)
    logmel = jnp.log(jnp.maximum(mel, OUTPUT_FLOOR))
    # per_bin_mean/stddev default to 0 / 1 -> identity normalization.
    return logmel, out_paddings


if __name__ == "__main__":
    key = jax.random.PRNGKey(0)
    B = 2
    T = FRAME_SIZE + FRAME_STEP * 7                                  # 1521 -> 8 frames
    k1, _ = jax.random.split(key)
    # int16-scale audio (forward divides by 2**15)
    inputs = jax.random.normal(k1, (B, T), jnp.float32) * 8000.0
    paddings_np = np.zeros((B, T), np.float32)
    paddings_np[1, -600:] = 1.0
    input_paddings = jnp.asarray(paddings_np)

    out, out_pad = jax.jit(mel_filterbank_frontend)(inputs, input_paddings)
    jax.block_until_ready(out)

    ref, ref_pad = reference_forward(inputs, input_paddings)
    np.testing.assert_allclose(np.asarray(out), np.asarray(ref), rtol=1e-2, atol=1e-2)
    np.testing.assert_allclose(np.asarray(out_pad), np.asarray(ref_pad), atol=0)

    assert out.shape == (B, 8, NUM_BINS) and out_pad.shape == (B, 8)
    print("KERNEL_OK")
</pallas_src>

<mosaic_0001>
module attributes {stable_mosaic.version = 11 : i64} {
  func.func @_melfb_kernel(%arg0: i32, %arg1: memref<8x401xf32, #tpu.memory_space<vmem>>, %arg2: memref<2x401x512xbf16, #tpu.memory_space<vmem>>, %arg3: memref<256x128xbf16, #tpu.memory_space<vmem>>, %arg4: memref<1x128xf32, #tpu.memory_space<vmem>>, %arg5: memref<1x128xf32, #tpu.memory_space<vmem>>, %arg6: memref<8x128xf32, #tpu.memory_space<vmem>>) attributes {dimension_semantics = [#tpu.dimension_semantics<parallel>], iteration_bounds = array<i64: 2>, scalar_prefetch = 0 : i64, scratch_operands = 0 : i64, tpu.core_type = #tpu.core_type<tc>, window_params = [{transform_indices = @transform_0, window_bounds = array<i64: 8, 401>}, {pipeline_mode = #tpu.pipeline_mode<synchronous>, transform_indices = @transform_1, window_bounds = array<i64: 2, 401, 512>}, {pipeline_mode = #tpu.pipeline_mode<synchronous>, transform_indices = @transform_2, window_bounds = array<i64: 256, 128>}, {pipeline_mode = #tpu.pipeline_mode<synchronous>, transform_indices = @transform_3, window_bounds = array<i64: 1, 128>}, {pipeline_mode = #tpu.pipeline_mode<synchronous>, transform_indices = @transform_4, window_bounds = array<i64: 1, 128>}, {transform_indices = @transform_5, window_bounds = array<i64: 8, 128>}]} {
    %c0 = arith.constant 0 : index
    %c0_0 = arith.constant 0 : index
    %0 = vector.load %arg1[%c0, %c0_0] : memref<8x401xf32, #tpu.memory_space<vmem>>, vector<8x401xf32>
    %1 = arith.truncf %0 : vector<8x401xf32> to vector<8x401xbf16>
    %2 = arith.extf %1 : vector<8x401xbf16> to vector<8x401xf32>
    %3 = arith.subf %0, %2 : vector<8x401xf32>
    %4 = arith.truncf %3 : vector<8x401xf32> to vector<8x401xbf16>
    %c0_1 = arith.constant 0 : index
    %c0_2 = arith.constant 0 : index
    %c0_3 = arith.constant 0 : index
    %5 = vector.load %arg2[%c0_1, %c0_2, %c0_3] : memref<2x401x512xbf16, #tpu.memory_space<vmem>>, vector<1x401x512xbf16>
    %6 = vector.shape_cast %5 : vector<1x401x512xbf16> to vector<401x512xbf16>
    %c1 = arith.constant 1 : index
    %c0_4 = arith.constant 0 : index
    %c0_5 = arith.constant 0 : index
    %7 = vector.load %arg2[%c1, %c0_4, %c0_5] : memref<2x401x512xbf16, #tpu.memory_space<vmem>>, vector<1x401x512xbf16>
    %8 = vector.shape_cast %7 : vector<1x401x512xbf16> to vector<401x512xbf16>
    %cst = arith.constant dense<0.000000e+00> : vector<8x512xf32>
    %9 = tpu.matmul %1, %6, %cst {dimension_numbers = #tpu.dot_dimension_numbers<[1], [0], [0], [1], [0, 0, 1, 1], [], []>} : vector<8x401xbf16>, vector<401x512xbf16>, vector<8x512xf32> -> vector<8x512xf32>
    %cst_6 = arith.constant dense<0.000000e+00> : vector<8x512xf32>
    %10 = tpu.matmul %4, %6, %cst_6 {dimension_numbers = #tpu.dot_dimension_numbers<[1], [0], [0], [1], [0, 0, 1, 1], [], []>} : vector<8x401xbf16>, vector<401x512xbf16>, vector<8x512xf32> -> vector<8x512xf32>
    %11 = arith.addf %9, %10 : vector<8x512xf32>
    %cst_7 = arith.constant dense<0.000000e+00> : vector<8x512xf32>
    %12 = tpu.matmul %1, %8, %cst_7 {dimension_numbers = #tpu.dot_dimension_numbers<[1], [0], [0], [1], [0, 0, 1, 1], [], []>} : vector<8x401xbf16>, vector<401x512xbf16>, vector<8x512xf32> -> vector<8x512xf32>
    %13 = arith.addf %11, %12 : vector<8x512xf32>
    %14 = vector.extract_strided_slice %13 {offsets = [0, 0], sizes = [8, 256], strides = [1, 1]} : vector<8x512xf32> to vector<8x256xf32>
    %15 = vector.extract_strided_slice %13 {offsets = [0, 256], sizes = [8, 256], strides = [1, 1]} : vector<8x512xf32> to vector<8x256xf32>
    %16 = arith.mulf %14, %14 : vector<8x256xf32>
    %17 = arith.mulf %15, %15 : vector<8x256xf32>
    %18 = arith.addf %16, %17 : vector<8x256xf32>
    %19 = arith.truncf %18 : vector<8x256xf32> to vector<8x256xbf16>
    %c0_8 = arith.constant 0 : index
    %c0_9 = arith.constant 0 : index
    %20 = vector.load %arg3[%c0_8, %c0_9] : memref<256x128xbf16, #tpu.memory_space<vmem>>, vector<256x128xbf16>
    %cst_10 = arith.constant dense<0.000000e+00> : vector<8x128xf32>
    %21 = tpu.matmul %19, %20, %cst_10 {dimension_numbers = #tpu.dot_dimension_numbers<[1], [0], [0], [1], [0, 0, 1, 1], [], []>} : vector<8x256xbf16>, vector<256x128xbf16>, vector<8x128xf32> -> vector<8x128xf32>
    %cst_11 = arith.constant 9.99999974E-6 : f32
    %22 = vector.broadcast %cst_11 : f32 to vector<8x128xf32>
    %23 = arith.maximumf %21, %22 : vector<8x128xf32>
    %24 = math.log %23 : vector<8x128xf32>
    %c0_12 = arith.constant 0 : index
    %c0_13 = arith.constant 0 : index
    %25 = vector.load %arg4[%c0_12, %c0_13] : memref<1x128xf32, #tpu.memory_space<vmem>>, vector<1x128xf32>
    %26 = vector.broadcast %25 : vector<1x128xf32> to vector<8x128xf32>
    %27 = arith.subf %24, %26 : vector<8x128xf32>
    %c0_14 = arith.constant 0 : index
    %c0_15 = arith.constant 0 : index
    %28 = vector.load %arg5[%c0_14, %c0_15] : memref<1x128xf32, #tpu.memory_space<vmem>>, vector<1x128xf32>
    %29 = vector.broadcast %28 : vector<1x128xf32> to vector<8x128xf32>
    %30 = arith.mulf %27, %29 : vector<8x128xf32>
    %c0_16 = arith.constant 0 : index
    %c0_17 = arith.constant 0 : index
    %31 = vector.load %arg6[%c0_16, %c0_17] : memref<8x128xf32, #tpu.memory_space<vmem>>, vector<8x128xf32>
    tpu.vector_store %arg6[%c0_16, %c0_17], %30 {strides = array<i32>} : memref<8x128xf32, #tpu.memory_space<vmem>>, vector<8x128xf32>,
    return
  }
  func.func @transform_0(%arg0: i32) -> (i32, i32) {
    %c0_i32 = arith.constant 0 : i32
    %c0_i32_0 = arith.constant 0 : i32
    return %arg0, %c0_i32 : i32, i32
  }
  func.func @transform_1(%arg0: i32) -> (i32, i32, i32) {
    %c0_i32 = arith.constant 0 : i32
    %c0_i32_0 = arith.constant 0 : i32
    %c0_i32_1 = arith.constant 0 : i32
    %c0_i32_2 = arith.constant 0 : i32
    return %c0_i32, %c0_i32_0, %c0_i32_1 : i32, i32, i32
  }
  func.func @transform_2(%arg0: i32) -> (i32, i32) {
    %c0_i32 = arith.constant 0 : i32
    %c0_i32_0 = arith.constant 0 : i32
    %c0_i32_1 = arith.constant 0 : i32
    return %c0_i32, %c0_i32_0 : i32, i32
  }
  func.func @transform_3(%arg0: i32) -> (i32, i32) {
    %c0_i32 = arith.constant 0 : i32
    %c0_i32_0 = arith.constant 0 : i32
    %c0_i32_1 = arith.constant 0 : i32
    return %c0_i32, %c0_i32_0 : i32, i32
  }
  func.func @transform_4(%arg0: i32) -> (i32, i32) {
    %c0_i32 = arith.constant 0 : i32
    %c0_i32_0 = arith.constant 0 : i32
    %c0_i32_1 = arith.constant 0 : i32
    return %c0_i32, %c0_i32_0 : i32, i32
  }
  func.func @transform_5(%arg0: i32) -> (i32, i32) {
    %c0_i32 = arith.constant 0 : i32
    %c0_i32_0 = arith.constant 0 : i32
    return %arg0, %c0_i32 : i32, i32
  }
}

</mosaic_0001>

<bundles_post_ra>
// kernel: mel_filterbank_frontend.1
= control target key start
LH: loop header
LB: loop body
LE: loop exit
PB: predicated region body
PF: predicated region fallthrough
CT: control target
= control target key end

     0   :  { %s2989_s18 = smov 0   ;;  %s4170_s0 = inlined_call_operand.vmem [shape: f32[16,401], index: 0, kind: input, shape index: {}]   ;;  %s4171_s1 = inlined_call_operand.vmem [shape: bf16[2,401,512], index: 1, kind: input, shape index: {}]   ;;  %s4172_s2 = inlined_call_operand.vmem [shape: bf16[256,128], index: 2, kind: input, shape index: {}]   ;;  %s4173_s3 = inlined_call_operand.vmem [shape: f32[1,128], index: 3, kind: input, shape index: {}]   ;;  %s4174_s4 = inlined_call_operand.vmem [shape: f32[1,128], index: 4, kind: input, shape index: {}]   ;;  %s4175_s5 = inlined_call_operand.vmem [shape: f32[16,128], index: 5, kind: output, shape index: {}]  }
   0x1 LB: > { %s2248_s19 = sadd.s32 4294967295, %s2956_s18   ;;  %p2252_p0 = scmp.ge.s32.totalorder %s2956_s18, 1  ;;  %s2956_s18 = sphi %s2989_s18, %s15_s18  }
   0x2   : > { %p187_p1 = scmp.lt.s32.totalorder %s2956_s18, 3 }
   0x4   : > { %p188_p2 = pnand %p2252_p0, %p187_p1 }
   0x6   : > { %191 = sbr.rel (%p188_p2) target bundleno = 751 (0x2ef), region = 40 }
   0xb   : > { %v3000_v0 = vld [vmem:[%s4171_s1 + $0xe4] ss:$16 sps:$4 sm:$0xff]   ;;  %v3011_v2 = vld [vmem:[%s4171_s1 + $0xe0] ss:$16 sps:$4 sm:$0xff]   ;;  %p214_p3 = scmp.lt.s32.totalorder %s2248_s19, 1  ;;  %vm963_vm0 = vcmask 1040384  }
   0xc   : > { %v3005_v1 = vld [vmem:[%s4171_s1 + $0x2e4] ss:$16 sps:$4 sm:$0xff]   ;;  %978 = vmatprep.subr.bf16.mxu0 %v3000_v0  ;;  %v3016_v3 = vld [vmem:[%s4171_s1 + $0x2e0] ss:$16 sps:$4 sm:$0xff]   ;;  %v2958_v33 = vmov 0   ;;  %vm959_vm1 = vcmask 138240  }
   0xd   : > { %1019 = vmatprep.subr.bf16.mxu1 %v3005_v1  ;;  %v3022_v4 = vld [vmem:[%s4171_s1 + $0xc4] ss:$16 sps:$4 sm:$0xff]   ;;  %979 = vmatpush1.bf16.msra.mxu0 %v3011_v2  ;;  %v3034_v6 = vld [vmem:[%s4171_s1 + $0xc0] ss:$16 sps:$4 sm:$0xff]   ;;  %s4320_s19 = smov (!%p214_p3, %s2248_s19), 1  ;;  %v3189_v34 = vsel %vm963_vm0, 65535, %v2958_v33 }
   0xe   : > { %1020 = vmatpush1.bf16.msra.mxu1 %v3016_v3  ;;  %v3029_v5 = vld [vmem:[%s4171_s1 + $0x2c4] ss:$16 sps:$4 sm:$0xff]   ;;  %980 = vmatprep.subr.bf16.mxu0 %v3022_v4  ;;  %v3040_v7 = vld [vmem:[%s4171_s1 + $0x2c0] ss:$16 sps:$4 sm:$0xff]   ;;  %s2592_s20 = sshll.u32 %s4320_s19, 5  ;;  %4225 = vst [vmem:[#allocation2_spill] sm:$0xff] %v3189_v34 }
   0xf   : > { %1021 = vmatprep.subr.bf16.mxu1 %v3029_v5  ;;  %v3046_v8 = vld [vmem:[%s4171_s1 + $0xa4] ss:$16 sps:$4 sm:$0xff]   ;;  %v3056_v10 = vld [vmem:[%s4171_s1 + $0xa0] ss:$16 sps:$4 sm:$0xff]   ;;  %s3162_s6 = scalar_lea.vmem %s4170_s0, %s2592_s20  ;;  %v3268_v55 = vld [vmem:[%s4171_s1 + $0xec] ss:$16 sps:$4 sm:$0xff]  }
  0x10   : > { %v3051_v9 = vld [vmem:[%s4171_s1 + $0x2a4] ss:$16 sps:$4 sm:$0xff]   ;;  %v3061_v11 = vld [vmem:[%s4171_s1 + $0x2a0] ss:$16 sps:$4 sm:$0xff]   ;;  %v227_v32 = vld [vmem:[%s3162_s6 + $0x18] sm:$0xff]  ;;  %s2255_s30 = sshll.u32 %s4320_s19, 3 }
  0x11   : > { %981 = vmatpush1.bf16.msra.mxu0 %v3034_v6  ;;  %v3068_v12 = vld [vmem:[%s4171_s1 + $0x84] ss:$16 sps:$4 sm:$0xff]   ;;  %v3080_v14 = vld [vmem:[%s4171_s1 + $0x80] ss:$16 sps:$4 sm:$0xff]   ;;  %v3191_v35 = vpack.c.bf16 %v227_v32, %v227_v32  ;;  %v3275_v57 = vld [vmem:[%s4171_s1 + $0xe8] ss:$16 sps:$4 sm:$0xff]   ;;  %s222_s11 = scalar_lea.vmem %s4175_s5, %s2255_s30 }
  0x12   : > { %1022 = vmatpush1.bf16.msra.mxu1 %v3040_v7  ;;  %982 = vmatprep.subr.bf16.mxu0 %v3046_v8  ;;  %v3075_v13 = vld [vmem:[%s4171_s1 + $0x284] ss:$16 sps:$4 sm:$0xff]   ;;  %v3089_v15 = vld [vmem:[%s4171_s1 + $0x280] ss:$16 sps:$4 sm:$0xff]   ;;  %v3294_v60 = vld [vmem:[%s4171_s1 + $0xcc] ss:$16 sps:$4 sm:$0xff]  }
  0x13   : > { %1023 = vmatprep.subr.bf16.mxu1 %v3051_v9  ;;  %v3094_v16 = vld [vmem:[%s4171_s1 + $0x64] ss:$16 sps:$4 sm:$0xff]   ;;  %v3106_v18 = vld [vmem:[%s4171_s1 + $0x60] ss:$16 sps:$4 sm:$0xff]   ;;  %v235_v40 = vunpack.c.l.bf16 %v3191_v35  ;;  %v225_v61 = vld [vmem:[%s3162_s6 + $0x8] sm:$0xff] }
  0x14   : > { %v3101_v17 = vld [vmem:[%s4171_s1 + $0x264] ss:$16 sps:$4 sm:$0xff]   ;;  %v3111_v19 = vld [vmem:[%s4171_s1 + $0x260] ss:$16 sps:$4 sm:$0xff]   ;;  %v3301_v62 = vld [vmem:[%s4171_s1 + $0xc8] ss:$16 sps:$4 sm:$0xff]   ;;  %v3303_v63 = vpack.c.bf16 %v225_v61, %v225_v61 }
  0x15   : > { %983 = vmatpush1.bf16.msra.mxu0 %v3056_v10  ;;  %v3122_v20 = vld [vmem:[%s4171_s1 + $0x44] ss:$16 sps:$4 sm:$0xff]   ;;  %v3134_v22 = vld [vmem:[%s4171_s1 + $0x40] ss:$16 sps:$4 sm:$0xff]   ;;  %v239_v44 = vsub.f32 %v227_v32, %v235_v40  ;;  %v3322_v32 = vld [vmem:[%s4171_s1 + $0xac] ss:$16 sps:$4 sm:$0xff]  }
  0x16   : > { %1024 = vmatpush1.bf16.msra.mxu1 %v3061_v11  ;;  %984 = vmatprep.subr.bf16.mxu0 %v3068_v12  ;;  %v3129_v21 = vld [vmem:[%s4171_s1 + $0x244] ss:$16 sps:$4 sm:$0xff]   ;;  %v3142_v23 = vld [vmem:[%s4171_s1 + $0x240] ss:$16 sps:$4 sm:$0xff]   ;;  %4227 = vst [vmem:[#allocation4_spill] sm:$0xff] %v3322_v32  ;;  %v233_v33 = vunpack.c.l.bf16 %v3303_v63 }
  0x17   : > { %1025 = vmatprep.subr.bf16.mxu1 %v3075_v13  ;;  %v3147_v24 = vld [vmem:[%s4171_s1 + $0x24] ss:$16 sps:$4 sm:$0xff]   ;;  %v3167_v27 = vld [vmem:[%s4171_s1 + $0x20] ss:$16 sps:$4 sm:$0xff]   ;;  %v3230_v48 = vpack.c.bf16 %v239_v44, %v239_v44 }
  0x18   : > { %v3154_v25 = vld [vmem:[%s4171_s1 + $0x224] ss:$16 sps:$4 sm:$0xff]   ;;  %v3174_v28 = vld [vmem:[%s4171_s1 + $0x220] ss:$16 sps:$4 sm:$0xff]   ;;  %v237_v40 = vsub.f32 %v225_v61, %v233_v33  ;;  %v3353_v33 = vld [vmem:[%s4171_s1 + $0x88] ss:$16 sps:$4 sm:$0xff]  }
  0x19   : > { %985 = vmatpush1.bf16.msra.mxu0 %v3080_v14  ;;  %v344_v26 = vld [vmem:[%s4171_s1 + $0x320] sm:$0x11]  ;;  %v226_v36 = vld [vmem:[%s3162_s6 + $0x10] sm:$0xff]  ;;  %2462 = vmatprep.mubr.msk.bf16.mxu1 %vm959_vm1, %v3230_v48  ;;  %4232 = vst [vmem:[#allocation9_spill] sm:$0xff] %v3353_v33 }
  0x1a   : > { %1026 = vmatpush1.bf16.msra.mxu1 %v3089_v15  ;;  %986 = vmatprep.subr.bf16.mxu0 %v3094_v16  ;;  %v3181_v29 = vld [vmem:[%s4171_s1 + $0x4] ss:$16 sps:$4 sm:$0xff]   ;;  %v2459_v31 = vcombine.high %v344_v26, %v344_v26  ;;  %v3199_v37 = vld [vmem:[%s4171_s1] ss:$16 sps:$4 sm:$0xff]   ;;  %v2458_v39 = vcombine.low %v344_v26, %v344_v26  ;;  %v3207_v41 = vpack.c.bf16 %v226_v36, %v226_v36 }
  0x1b   : > { %1027 = vmatprep.subr.bf16.mxu1 %v3101_v17  ;;  %v3186_v30 = vld [vmem:[%s4171_s1 + $0x204] ss:$16 sps:$4 sm:$0xff]   ;;  %v3204_v38 = vld [vmem:[%s4171_s1 + $0x200] ss:$16 sps:$4 sm:$0xff]   ;;  %v241_v61 = vpack.c.bf16 %v237_v40, %v237_v40 }
  0x1c   : > { %v3214_v42 = vld [vmem:[%s4171_s1 + $0x1e4] ss:$16 sps:$4 sm:$0xff]   ;;  %v3217_v43 = vand.u32 %v2459_v31, %v3189_v34  ;;  %v234_v45 = vunpack.c.l.bf16 %v3207_v41  ;;  %v3225_v46 = vld [vmem:[%s4171_s1 + $0x1e0] ss:$16 sps:$4 sm:$0xff]   ;;  %v3228_v47 = vand.u32 %v2458_v39, %v3189_v34 }
  0x1d   : > { %987 = vmatpush1.bf16.msra.mxu0 %v3106_v18  ;;  %v3237_v49 = vld [vmem:[%s4171_s1 + $0x1c4] ss:$16 sps:$4 sm:$0xff]   ;;  %v3251_v52 = vld [vmem:[%s4171_s1 + $0x1c0] ss:$16 sps:$4 sm:$0xff]   ;;  %1010 = vmatprep.mubr.bf16.mxu0 %v241_v61 }
  0x1e   : > { %1028 = vmatpush1.bf16.msra.mxu1 %v3111_v19  ;;  %988 = vmatprep.subr.bf16.mxu0 %v3122_v20  ;;  %v3242_v50 = vld [vmem:[%s4171_s1 + $0x304] ss:$16 sps:$4 sm:$0xff]   ;;  %v238_v51 = vsub.f32 %v226_v36, %v234_v45  ;;  %v3256_v53 = vld [vmem:[%s4171_s1 + $0x300] ss:$16 sps:$4 sm:$0xff]   ;;  %v3328_v36 = vld [vmem:[%s4171_s1 + $0xa8] ss:$16 sps:$4 sm:$0xff]  }
  0x1f   : > { %1029 = vmatprep.subr.bf16.mxu1 %v3129_v21  ;;  %v3261_v54 = vld [vmem:[%s4171_s1 + $0x1a4] ss:$16 sps:$4 sm:$0xff]   ;;  %v3282_v58 = vld [vmem:[%s4171_s1 + $0x1a0] ss:$16 sps:$4 sm:$0xff]   ;;  %4228 = vst [vmem:[#allocation5_spill] sm:$0xff] %v3328_v36 }
  0x20   : > { %v3270_v56 = vpack.c.bf16 %v238_v51, %v238_v51  ;;  %v3289_v59 = vld [vmem:[%s4171_s1 + $0x184] ss:$16 sps:$4 sm:$0xff]   ;;  %v3310_v26 = vld [vmem:[%s4171_s1 + $0x180] ss:$16 sps:$4 sm:$0xff]   ;;  %v3348_v51 = vld [vmem:[%s4171_s1 + $0x8c] ss:$16 sps:$4 sm:$0xff]  }
  0x21   : > { %989 = vmatpush1.bf16.msra.mxu0 %v3134_v22  ;;  %v3317_v31 = vld [vmem:[%s4171_s1 + $0x164] ss:$16 sps:$4 sm:$0xff]   ;;  %v3333_v39 = vld [vmem:[%s4171_s1 + $0x160] ss:$16 sps:$4 sm:$0xff]   ;;  %4231 = vst [vmem:[#allocation8_spill] sm:$0xff] %v3348_v51 }
  0x22   : > { %1030 = vmatpush1.bf16.msra.mxu1 %v3142_v23  ;;  %990 = vmatprep.subr.bf16.mxu0 %v3147_v24  ;;  %4226 = vst [vmem:[#allocation3_spill] sm:$0xff] %v3317_v31  ;;  %4229 = vst [vmem:[#allocation6_spill] sm:$0xff] %v3333_v39  ;;  %v224_v44 = vld [vmem:[%s3162_s6] sm:$0xff] }
  0x23   : > { %1031 = vmatprep.subr.bf16.mxu1 %v3154_v25  ;;  %v3343_v45 = vld [vmem:[%s4171_s1 + $0x144] ss:$16 sps:$4 sm:$0xff]  }
  0x24   : > { %4230 = vst [vmem:[#allocation7_spill] sm:$0xff] %v3343_v45  ;;  %v3369_v40 = vld [vmem:[%s4171_s1 + $0x124] ss:$16 sps:$4 sm:$0xff]  }
  0x25   : > { %991 = vmatpush1.bf16.msra.mxu0 %v3167_v27  ;;  %4235 = vst [vmem:[#allocation12_spill] sm:$0xff] %v3369_v40 }
  0x26   : > { %1032 = vmatpush1.bf16.msra.mxu1 %v3174_v28  ;;  %992 = vmatprep.subr.bf16.mxu0 %v3181_v29 }
  0x27   : > { %1033 = vmatprep.subr.bf16.mxu1 %v3186_v30 }
  0x29   : > { %993 = vmatpush1.bf16.msra.mxu0 %v3199_v37 }
  0x2a   : > { %1034 = vmatpush1.bf16.msra.mxu1 %v3204_v38  ;;  %994 = vmatprep.subr.bf16.mxu0 %v3214_v42 }
  0x2b   : > { %1047 = vmatprep.subr.bf16.mxu1 %v3217_v43 }
  0x2d   : > { %995 = vmatpush2.bf16.msra.mxu0 %v3225_v46 }
  0x2e   : > { %1048 = vmatpush2.bf16.msra.mxu1 %v3228_v47  ;;  %996 = vmatprep.subr.bf16.mxu0 %v3237_v49 }
  0x2f   : > { %1049 = vmatprep.subr.bf16.mxu1 %v3242_v50 }
  0x31   : > { %997 = vmatpush2.bf16.msra.mxu0 %v3251_v52 }
  0x32   : > { %1050 = vmatpush2.bf16.msra.mxu1 %v3256_v53  ;;  %998 = vmatprep.subr.bf16.mxu0 %v3261_v54 }
  0x33   : > { %1060 = vmatprep.subr.bf16.mxu1 %v3268_v55 }
  0x35   : > { %1052 = vmatmul.mubr.bf16.vlgmr.msra.gmra.mxu1 %v3270_v56  ;;  %999 = vmatpush2.bf16.msra.mxu0 %v3282_v58 }
  0x36   : > { %1061 = vmatpush1.bf16.msra.mxu1 %v3275_v57  ;;  %1000 = vmatprep.subr.bf16.mxu0 %v3289_v59 }
  0x37   : > { %1062 = vmatprep.subr.bf16.mxu1 %v3294_v60  ;;  %1092 = vmatprep.mubr.bf16.mxu1 %v241_v61  ;;  %v3374_v61 = vld [vmem:[%s4171_s1 + $0x6c] ss:$16 sps:$4 sm:$0xff]  }
  0x38   : > { %4236 = vst [vmem:[#allocation13_spill] sm:$0xff] %v3374_v61 }
  0x39   : > { %1001 = vmatpush2.bf16.msra.mxu0 %v3310_v26 }
  0x3a   : > { %1063 = vmatpush1.bf16.msra.mxu1 %v3301_v62  ;;  %1002 = vmatprep.subr.bf16.mxu0 %v3317_v31  ;;  %v3355_v31 = vpack.c.bf16 %v224_v44, %v224_v44 }
  0x3b   : > { %1064 = vmatprep.subr.bf16.mxu1 %v3322_v32  ;;  %v3362_v32 = vld [vmem:[%s4171_s1 + $0x140] ss:$16 sps:$4 sm:$0xff]  }
  0x3c   : > { %4233 = vst [vmem:[#allocation10_spill] sm:$0xff] %v3355_v31  ;;  %4234 = vst [vmem:[#allocation11_spill] sm:$0xff] %v3362_v32 }
  0x3d   : > { %1003 = vmatpush2.bf16.msra.mxu0 %v3333_v39  ;;  %v232_v39 = vunpack.c.l.bf16 %v3355_v31  ;;  %v3399_v31 = vld [vmem:[%s4171_s1 + $0x4c] ss:$16 sps:$4 sm:$0xff]  }
  0x3e   : > { %1065 = vmatpush1.bf16.msra.mxu1 %v3328_v36  ;;  %1004 = vmatprep.subr.bf16.mxu0 %v3343_v45  ;;  %v3379_v36 = vld [vmem:[%s4171_s1 + $0x68] ss:$16 sps:$4 sm:$0xff]   ;;  %v3394_v45 = vld [vmem:[%s4171_s1 + $0x104] ss:$16 sps:$4 sm:$0xff]   ;;  %4240 = vst [vmem:[#allocation17_spill] sm:$0xff] %v3399_v31 }
  0x3f   : > { %1066 = vmatprep.subr.bf16.mxu1 %v3348_v51  ;;  %4237 = vst [vmem:[#allocation14_spill] sm:$0xff] %v3379_v36  ;;  %v3387_v51 = vld [vmem:[%s4171_s1 + $0x120] ss:$16 sps:$4 sm:$0xff]   ;;  %4239 = vst [vmem:[#allocation16_spill] sm:$0xff] %v3394_v45 }
  0x40   : > { %4238 = vst [vmem:[#allocation15_spill] sm:$0xff] %v3387_v51 }
  0x41   : > { %1005 = vmatpush2.bf16.msra.mxu0 %v3362_v32  ;;  %v236_v32 = vsub.f32 %v224_v44, %v232_v39  ;;  %v3423_v39 = vld [vmem:[%s4171_s1 + $0x2ec] ss:$16 sps:$4 sm:$0xff]  }
  0x42   : > { %1067 = vmatpush1.bf16.msra.mxu1 %v3353_v33  ;;  %1006 = vmatprep.subr.bf16.mxu0 %v3369_v40  ;;  %v3404_v33 = vld [vmem:[%s4171_s1 + $0x48] ss:$16 sps:$4 sm:$0xff]   ;;  %v3418_v40 = vld [vmem:[%s4171_s1 + $0x2c] ss:$16 sps:$4 sm:$0xff]   ;;  %4244 = vst [vmem:[#allocation21_spill] sm:$0xff] %v3423_v39 }
  0x43   : > { %1068 = vmatprep.subr.bf16.mxu1 %v3374_v61  ;;  %4241 = vst [vmem:[#allocation18_spill] sm:$0xff] %v3404_v33  ;;  %v3411_v61 = vld [vmem:[%s4171_s1 + $0x100] ss:$16 sps:$4 sm:$0xff]   ;;  %4243 = vst [vmem:[#allocation20_spill] sm:$0xff] %v3418_v40  ;;  %v3425_v44 = vpack.c.bf16 %v236_v32, %v236_v32  ;;  %v3444_v32 = vld [vmem:[%s4171_s1 + $0xc] ss:$16 sps:$4 sm:$0xff]  }
  0x44   : > { %4242 = vst [vmem:[#allocation19_spill] sm:$0xff] %v3411_v61  ;;  %4247 = vst [vmem:[#allocation24_spill] sm:$0xff] %v3444_v32 }
  0x45   : > { %1007 = vmatpush2.bf16.msra.mxu0 %v3387_v51  ;;  %v3491_v51 = vld [vmem:[%s4171_s1 + $0x1cc] ss:$16 sps:$4 sm:$0xff]  }
  0x46   : > { %1069 = vmatpush1.bf16.msra.mxu1 %v3379_v36  ;;  %1008 = vmatprep.subr.bf16.mxu0 %v3394_v45  ;;  %v3430_v36 = vld [vmem:[%s4171_s1 + $0x28] ss:$16 sps:$4 sm:$0xff]   ;;  %v3472_v45 = vld [vmem:[%s4171_s1 + $0x2ac] ss:$16 sps:$4 sm:$0xff]   ;;  %4254 = vst [vmem:[#allocation31_spill] sm:$0xff] %v3491_v51 }
  0x47   : > { %1070 = vmatprep.subr.bf16.mxu1 %v3399_v31  ;;  %4245 = vst [vmem:[#allocation22_spill] sm:$0xff] %v3430_v36  ;;  %v3437_v31 = vld [vmem:[%s4171_s1 + $0x2e8] ss:$16 sps:$4 sm:$0xff]   ;;  %4252 = vst [vmem:[#allocation29_spill] sm:$0xff] %v3472_v45 }
  0x48   : > { %4246 = vst [vmem:[#allocation23_spill] sm:$0xff] %v3437_v31 }
  0x49   : > { %1009 = vmatpush2.bf16.msra.mxu0 %v3411_v61  ;;  %v3449_v61 = vld [vmem:[%s4171_s1 + $0x2cc] ss:$16 sps:$4 sm:$0xff]  }
  0x4a   : > { %1071 = vmatpush1.bf16.msra.mxu1 %v3404_v33  ;;  %1101 = vmatprep.subr.bf16.mxu0 %v3423_v39  ;;  %4248 = vst [vmem:[#allocation25_spill] sm:$0xff] %v3449_v61  ;;  %v3454_v33 = vld [vmem:[%s4171_s1 + $0x8] ss:$16 sps:$4 sm:$0xff]  }
  0x4b   : > { %1072 = vmatprep.subr.bf16.mxu1 %v3418_v40  ;;  %4249 = vst [vmem:[#allocation26_spill] sm:$0xff] %v3454_v33  ;;  %v3460_v39 = vld [vmem:[%s4171_s1 + $0x2c8] ss:$16 sps:$4 sm:$0xff]   ;;  %v3467_v40 = vld [vmem:[%s4171_s1 + $0x1ec] ss:$16 sps:$4 sm:$0xff]  }
  0x4c   : > { %1011 = vmatmul.mubr.bf16.vlgmr.msra.gmra.mxu0 %v3425_v44  ;;  %4250 = vst [vmem:[#allocation27_spill] sm:$0xff] %v3460_v39  ;;  %4251 = vst [vmem:[#allocation28_spill] sm:$0xff] %v3467_v40 }
  0x4d   : > { %1102 = vmatpush1.bf16.msra.mxu0 %v3437_v31  ;;  %v3484_v31 = vld [vmem:[%s4171_s1 + $0x2a8] ss:$16 sps:$4 sm:$0xff]   ;;  %2463 = vmatprep.mubr.msk.bf16.mxu0 %vm959_vm1, %v3230_v48 }
  0x4e   : > { %1073 = vmatpush1.bf16.msra.mxu1 %v3430_v36  ;;  %1103 = vmatprep.subr.bf16.mxu0 %v3449_v61  ;;  %v3479_v36 = vld [vmem:[%s4171_s1 + $0x1e8] ss:$16 sps:$4 sm:$0xff]   ;;  %4253 = vst [vmem:[#allocation30_spill] sm:$0xff] %v3484_v31  ;;  %v3496_v61 = vld [vmem:[%s4171_s1 + $0x28c] ss:$16 sps:$4 sm:$0xff]  }
  0x4f   : > { %1074 = vmatprep.subr.bf16.mxu1 %v3444_v32  ;;  %4255 = vst [vmem:[#allocation32_spill] sm:$0xff] %v3496_v61  ;;  %v3505_v48 = vld [vmem:[%s4171_s1 + $0x1c8] ss:$16 sps:$4 sm:$0xff]  }
  0x50   : > { %4256 = vst [vmem:[#allocation33_spill] sm:$0xff] %v3505_v48  ;;  %v3510_v32 = vld [vmem:[%s4171_s1 + $0x288] ss:$16 sps:$4 sm:$0xff]  }
  0x51   : > { %1104 = vmatpush1.bf16.msra.mxu0 %v3460_v39  ;;  %4257 = vst [vmem:[#allocation34_spill] sm:$0xff] %v3510_v32  ;;  %v3534_v39 = vld [vmem:[%s4171_s1 + $0x268] ss:$16 sps:$4 sm:$0xff]  }
  0x52   : > { %1075 = vmatpush1.bf16.msra.mxu1 %v3454_v33  ;;  %1105 = vmatprep.subr.bf16.mxu0 %v3472_v45  ;;  %v3515_v33 = vld [vmem:[%s4171_s1 + $0x1ac] ss:$16 sps:$4 sm:$0xff]   ;;  %v3529_v45 = vld [vmem:[%s4171_s1 + $0x1a8] ss:$16 sps:$4 sm:$0xff]   ;;  %4261 = vst [vmem:[#allocation38_spill] sm:$0xff] %v3534_v39 }
  0x53   : > { %1076 = vmatprep.subr.bf16.mxu1 %v3467_v40  ;;  %4258 = vst [vmem:[#allocation35_spill] sm:$0xff] %v3515_v33  ;;  %v3520_v40 = vld [vmem:[%s4171_s1 + $0x26c] ss:$16 sps:$4 sm:$0xff]   ;;  %4260 = vst [vmem:[#allocation37_spill] sm:$0xff] %v3529_v45 }
  0x54   : > { %4259 = vst [vmem:[#allocation36_spill] sm:$0xff] %v3520_v40 }
  0x55   : > { %1106 = vmatpush1.bf16.msra.mxu0 %v3484_v31 }
  0x56   : > { %1077 = vmatpush2.bf16.msra.mxu1 %v3479_v36  ;;  %1107 = vmatprep.subr.bf16.mxu0 %v3496_v61  ;;  %v3543_v61 = vld [vmem:[%s4171_s1 + $0x18c] ss:$16 sps:$4 sm:$0xff]  }
  0x57   : > { %1078 = vmatprep.subr.bf16.mxu1 %v3491_v51  ;;  %4262 = vst [vmem:[#allocation39_spill] sm:$0xff] %v3543_v61  ;;  %v3548_v51 = vld [vmem:[%s4171_s1 + $0x24c] ss:$16 sps:$4 sm:$0xff]  }
  0x58   : > { %4263 = vst [vmem:[#allocation40_spill] sm:$0xff] %v3548_v51 }
  0x59   : > { %1108 = vmatpush1.bf16.msra.mxu0 %v3510_v32  ;;  %v3582_v32 = vld [vmem:[%s4171_s1 + $0x168] ss:$16 sps:$4 sm:$0xff]  }
  0x5a   : > { %1079 = vmatpush2.bf16.msra.mxu1 %v3505_v48  ;;  %1109 = vmatprep.subr.bf16.mxu0 %v3520_v40  ;;  %v3553_v48 = vld [vmem:[%s4171_s1 + $0x188] ss:$16 sps:$4 sm:$0xff]   ;;  %4268 = vst [vmem:[#allocation45_spill] sm:$0xff] %v3582_v32 }
  0x5b   : > { %1080 = vmatprep.subr.bf16.mxu1 %v3515_v33  ;;  %4264 = vst [vmem:[#allocation41_spill] sm:$0xff] %v3553_v48  ;;  %v3560_v40 = vld [vmem:[%s4171_s1 + $0x248] ss:$16 sps:$4 sm:$0xff]   ;;  %v3565_v33 = vld [vmem:[%s4171_s1 + $0x16c] ss:$16 sps:$4 sm:$0xff]  }
  0x5c   : > { %4265 = vst [vmem:[#allocation42_spill] sm:$0xff] %v3560_v40  ;;  %4266 = vst [vmem:[#allocation43_spill] sm:$0xff] %v3565_v33 }
  0x5d   : > { %1110 = vmatpush1.bf16.msra.mxu0 %v3534_v39  ;;  %v345_v39 = vld [vmem:[%s4171_s1 + $0x328] sm:$0x11] }
  0x5e   : > { %1081 = vmatpush2.bf16.msra.mxu1 %v3529_v45  ;;  %1111 = vmatprep.subr.bf16.mxu0 %v3548_v51  ;;  %v3572_v45 = vld [vmem:[%s4171_s1 + $0x22c] ss:$16 sps:$4 sm:$0xff]   ;;  %v3587_v51 = vld [vmem:[%s4171_s1 + $0x228] ss:$16 sps:$4 sm:$0xff]   ;;  %v2460_v31 = vcombine.low %v345_v39, %v345_v39 }
  0x5f   : > { %1082 = vmatprep.subr.bf16.mxu1 %v3543_v61  ;;  %4267 = vst [vmem:[#allocation44_spill] sm:$0xff] %v3572_v45  ;;  %4269 = vst [vmem:[#allocation46_spill] sm:$0xff] %v3587_v51  ;;  %v2461_v61 = vcombine.high %v345_v39, %v345_v39  ;;  %v3628_v39 = vld [vmem:[%s4171_s1 + $0x128] ss:$16 sps:$4 sm:$0xff]  }
  0x61   : > { %1112 = vmatpush1.bf16.msra.mxu0 %v3560_v40  ;;  %v3599_v40 = vld [vmem:[%s4171_s1 + $0x20c] ss:$16 sps:$4 sm:$0xff]  }
  0x62   : > { %1083 = vmatpush2.bf16.msra.mxu1 %v3553_v48  ;;  %1113 = vmatprep.subr.bf16.mxu0 %v3572_v45  ;;  %v3594_v48 = vld [vmem:[%s4171_s1 + $0x14c] ss:$16 sps:$4 sm:$0xff]   ;;  %v3611_v45 = vld [vmem:[%s4171_s1 + $0x208] ss:$16 sps:$4 sm:$0xff]  }
  0x63   : > { %1084 = vmatprep.subr.bf16.mxu1 %v3565_v33  ;;  %4270 = vst [vmem:[#allocation47_spill] sm:$0xff] %v3594_v48  ;;  %v3606_v33 = vld [vmem:[%s4171_s1 + $0x148] ss:$16 sps:$4 sm:$0xff]   ;;  %4271 = vst [vmem:[#allocation48_spill] sm:$0xff] %v3611_v45 }
  0x65   : > { %1114 = vmatpush1.bf16.msra.mxu0 %v3587_v51  ;;  %v3621_v51 = vand.u32 %v2461_v61, %v3189_v34  ;;  %v3638_v61 = vld [vmem:[%s4171_s1 + $0x10c] ss:$16 sps:$4 sm:$0xff]  }
  0x66   : > { %1085 = vmatpush2.bf16.msra.mxu1 %v3582_v32  ;;  %1115 = vmatprep.subr.bf16.mxu0 %v3599_v40  ;;  %v3618_v32 = vld [vmem:[%s4171_s1 + $0x12c] ss:$16 sps:$4 sm:$0xff]  }
  0x67   : > { %1086 = vmatprep.subr.bf16.mxu1 %v3594_v48  ;;  %v3631_v48 = vand.u32 %v2460_v31, %v3189_v34  ;;  %v3650_v31 = vld [vmem:[%s4171_s1 + $0x108] ss:$16 sps:$4 sm:$0xff]  }
  0x68   : > { %v3655_v34 = vld [vmem:[%s4171_s1 + $0x308] ss:$16 sps:$4 sm:$0xff]  }
  0x69   : > { %1116 = vmatpush1.bf16.msra.mxu0 %v3611_v45  ;;  %v3643_v45 = vld [vmem:[%s4171_s1 + $0x30c] ss:$16 sps:$4 sm:$0xff]  }
  0x6a   : > { %1087 = vmatpush2.bf16.msra.mxu1 %v3606_v33  ;;  %1129 = vmatprep.subr.bf16.mxu0 %v3621_v51 }
  0x6b   : > { %1088 = vmatprep.subr.bf16.mxu1 %v3618_v32 }
  0x6d   : > { %1130 = vmatpush2.bf16.msra.mxu0 %v3631_v48 }
  0x6e   : > { %1089 = vmatpush2.bf16.msra.mxu1 %v3628_v39  ;;  %1131 = vmatprep.subr.bf16.mxu0 %v3643_v45 }
  0x6f   : > { %1090 = vmatprep.subr.bf16.mxu1 %v3638_v61 }
  0x71   : > { %1132 = vmatpush2.bf16.msra.mxu0 %v3655_v34 }
  0x72   : > { %1091 = vmatpush2.bf16.msra.mxu1 %v3650_v31  ;;  %1145 = vmatprep.subr.bf16.mxu0 %v3000_v0  ;;  %v4272_v0 = vld [vmem:[#allocation3_spill] sm:$0xff] }
  0x73   : > { %1186 = vmatprep.subr.bf16.mxu1 %v3005_v1  ;;  %v4273_v1 = vld [vmem:[#allocation4_spill] sm:$0xff] }
  0x74   : > { %1134 = vmatmul.mubr.bf16.vlgmr.msra.gmra.mxu0 %v3270_v56  ;;  %v4314_v56 = vld [vmem:[#allocation45_spill] sm:$0xff] }
  0x75   : > { %1093 = vmatmul.mubr.bf16.vlgmr.msra.gmra.mxu1 %v3425_v44  ;;  %1146 = vmatpush1.bf16.msra.mxu0 %v3011_v2  ;;  %v4274_v2 = vld [vmem:[#allocation6_spill] sm:$0xff] }
  0x76   : > { %1187 = vmatpush1.bf16.msra.mxu1 %v3016_v3  ;;  %1147 = vmatprep.subr.bf16.mxu0 %v3022_v4  ;;  %v4275_v3 = vld [vmem:[#allocation5_spill] sm:$0xff]  ;;  %v4276_v4 = vld [vmem:[#allocation7_spill] sm:$0xff]  ;;  %v2795_v44 = vld [vmem:[%s4171_s1 + $0x5d4] ss:$16 sps:$4 sm:$0xff]  }
  0x77   : > { %1188 = vmatprep.subr.bf16.mxu1 %v3029_v5  ;;  %2464 = vmatprep.mubr.msk.bf16.mxu1 %vm959_vm1, %v3191_v35  ;;  %v4277_v5 = vld [vmem:[#allocation8_spill] sm:$0xff] }
  0x78   : > { %1177 = vmatprep.mubr.bf16.mxu0 %v3303_v63 }
  0x79   : > { %1148 = vmatpush1.bf16.msra.mxu0 %v3034_v6  ;;  %v4278_v6 = vld [vmem:[#allocation11_spill] sm:$0xff] }
  0x7a   : > { %1189 = vmatpush1.bf16.msra.mxu1 %v3040_v7  ;;  %1149 = vmatprep.subr.bf16.mxu0 %v3046_v8  ;;  %v4279_v7 = vld [vmem:[#allocation9_spill] sm:$0xff]  ;;  %v4280_v8 = vld [vmem:[#allocation12_spill] sm:$0xff] }
  0x7b   : > { %1190 = vmatprep.subr.bf16.mxu1 %v3051_v9  ;;  %v4281_v9 = vld [vmem:[#allocation13_spill] sm:$0xff] }
  0x7d   : > { %1150 = vmatpush1.bf16.msra.mxu0 %v3056_v10  ;;  %v4282_v10 = vld [vmem:[#allocation15_spill] sm:$0xff] }
  0x7e   : > { %1191 = vmatpush1.bf16.msra.mxu1 %v3061_v11  ;;  %1151 = vmatprep.subr.bf16.mxu0 %v3068_v12  ;;  %v4283_v11 = vld [vmem:[#allocation14_spill] sm:$0xff]  ;;  %v4284_v12 = vld [vmem:[#allocation16_spill] sm:$0xff] }
  0x7f   : > { %1192 = vmatprep.subr.bf16.mxu1 %v3075_v13  ;;  %v4285_v13 = vld [vmem:[#allocation17_spill] sm:$0xff] }
  0x81   : > { %1152 = vmatpush1.bf16.msra.mxu0 %v3080_v14  ;;  %v4286_v14 = vld [vmem:[#allocation19_spill] sm:$0xff] }
  0x82   : > { %1193 = vmatpush1.bf16.msra.mxu1 %v3089_v15  ;;  %1153 = vmatprep.subr.bf16.mxu0 %v3094_v16  ;;  %v4287_v15 = vld [vmem:[#allocation18_spill] sm:$0xff]  ;;  %v4288_v16 = vld [vmem:[#allocation20_spill] sm:$0xff] }
  0x83   : > { %1194 = vmatprep.subr.bf16.mxu1 %v3101_v17  ;;  %v4289_v17 = vld [vmem:[#allocation21_spill] sm:$0xff] }
  0x85   : > { %1154 = vmatpush1.bf16.msra.mxu0 %v3106_v18  ;;  %v4290_v18 = vld [vmem:[#allocation10_spill] sm:$0xff] }
  0x86   : > { %1195 = vmatpush1.bf16.msra.mxu1 %v3111_v19  ;;  %1155 = vmatprep.subr.bf16.mxu0 %v3122_v20  ;;  %v4291_v19 = vld [vmem:[#allocation22_spill] sm:$0xff]  ;;  %v4292_v20 = vld [vmem:[#allocation23_spill] sm:$0xff] }
  0x87   : > { %1196 = vmatprep.subr.bf16.mxu1 %v3129_v21  ;;  %v4293_v21 = vld [vmem:[#allocation24_spill] sm:$0xff] }
  0x89   : > { %1156 = vmatpush1.bf16.msra.mxu0 %v3134_v22  ;;  %v4294_v22 = vld [vmem:[#allocation25_spill] sm:$0xff] }
  0x8a   : > { %1197 = vmatpush1.bf16.msra.mxu1 %v3142_v23  ;;  %1157 = vmatprep.subr.bf16.mxu0 %v3147_v24  ;;  %v4295_v23 = vld [vmem:[#allocation26_spill] sm:$0xff]  ;;  %v4296_v24 = vld [vmem:[#allocation27_spill] sm:$0xff] }
  0x8b   : > { %1198 = vmatprep.subr.bf16.mxu1 %v3154_v25  ;;  %v4297_v25 = vld [vmem:[#allocation28_spill] sm:$0xff] }
  0x8d   : > { %1158 = vmatpush1.bf16.msra.mxu0 %v3167_v27  ;;  %v4298_v27 = vld [vmem:[#allocation29_spill] sm:$0xff] }
  0x8e   : > { %1199 = vmatpush1.bf16.msra.mxu1 %v3174_v28  ;;  %1159 = vmatprep.subr.bf16.mxu0 %v3181_v29  ;;  %v4299_v28 = vld [vmem:[#allocation30_spill] sm:$0xff]  ;;  %v4300_v29 = vld [vmem:[#allocation31_spill] sm:$0xff] }
  0x8f   : > { %1200 = vmatprep.subr.bf16.mxu1 %v3186_v30  ;;  %v4301_v30 = vld [vmem:[#allocation32_spill] sm:$0xff] }
  0x91   : > { %1160 = vmatpush1.bf16.msra.mxu0 %v3199_v37  ;;  %v4302_v37 = vld [vmem:[#allocation33_spill] sm:$0xff] }
  0x92   : > { %1201 = vmatpush1.bf16.msra.mxu1 %v3204_v38  ;;  %1161 = vmatprep.subr.bf16.mxu0 %v3214_v42  ;;  %v4303_v38 = vld [vmem:[#allocation34_spill] sm:$0xff]  ;;  %v4304_v42 = vld [vmem:[#allocation35_spill] sm:$0xff] }
  0x93   : > { %1214 = vmatprep.subr.bf16.mxu1 %v3217_v43  ;;  %v4305_v43 = vld [vmem:[#allocation36_spill] sm:$0xff] }
  0x95   : > { %1162 = vmatpush2.bf16.msra.mxu0 %v3225_v46  ;;  %v4306_v46 = vld [vmem:[#allocation37_spill] sm:$0xff] }
  0x96   : > { %1215 = vmatpush2.bf16.msra.mxu1 %v3228_v47  ;;  %1163 = vmatprep.subr.bf16.mxu0 %v3237_v49  ;;  %v4307_v47 = vld [vmem:[#allocation38_spill] sm:$0xff]  ;;  %v4308_v49 = vld [vmem:[#allocation39_spill] sm:$0xff] }
  0x97   : > { %1216 = vmatprep.subr.bf16.mxu1 %v3242_v50  ;;  %v4309_v50 = vld [vmem:[#allocation40_spill] sm:$0xff] }
  0x99   : > { %1164 = vmatpush2.bf16.msra.mxu0 %v3251_v52  ;;  %v4310_v52 = vld [vmem:[#allocation41_spill] sm:$0xff] }
  0x9a   : > { %1217 = vmatpush2.bf16.msra.mxu1 %v3256_v53  ;;  %1165 = vmatprep.subr.bf16.mxu0 %v3261_v54  ;;  %v4311_v53 = vld [vmem:[#allocation42_spill] sm:$0xff]  ;;  %v4312_v54 = vld [vmem:[#allocation43_spill] sm:$0xff] }
  0x9b   : > { %1227 = vmatprep.subr.bf16.mxu1 %v3268_v55  ;;  %v4313_v55 = vld [vmem:[#allocation44_spill] sm:$0xff] }
  0x9d   : > { %1219 = vmatmul.mubr.bf16.vlgmr.msra.gmra.mxu1 %v3207_v41  ;;  %1166 = vmatpush2.bf16.msra.mxu0 %v3282_v58  ;;  %v4316_v58 = vld [vmem:[#allocation47_spill] sm:$0xff] }
  0x9e   : > { %1228 = vmatpush1.bf16.msra.mxu1 %v3275_v57  ;;  %1167 = vmatprep.subr.bf16.mxu0 %v3289_v59  ;;  %v4315_v57 = vld [vmem:[#allocation46_spill] sm:$0xff]  ;;  %v4317_v59 = vld [vmem:[#allocation48_spill] sm:$0xff] }
  0x9f   : > { %1229 = vmatprep.subr.bf16.mxu1 %v3294_v60  ;;  %1259 = vmatprep.mubr.bf16.mxu1 %v3303_v63  ;;  %v2780_v60 = vld [vmem:[%s4171_s1 + $0x414] ss:$16 sps:$4 sm:$0xff]  }
  0xa1   : > { %1168 = vmatpush2.bf16.msra.mxu0 %v3310_v26  ;;  %v2778_v26 = vld [vmem:[%s4171_s1 + $0x410] ss:$16 sps:$4 sm:$0xff]  }
  0xa2   : > { %1230 = vmatpush1.bf16.msra.mxu1 %v3301_v62  ;;  %1169 = vmatprep.subr.bf16.mxu0 %v4272_v0  ;;  %v2783_v62 = vld [vmem:[%s4171_s1 + $0x614] ss:$16 sps:$4 sm:$0xff]   ;;  %v2799_v0 = vld [vmem:[%s4171_s1 + $0x5b0] ss:$16 sps:$4 sm:$0xff]  }
  0xa3   : > { %1231 = vmatprep.subr.bf16.mxu1 %v4273_v1  ;;  %v2804_v1 = vld [vmem:[%s4171_s1 + $0x394] ss:$16 sps:$4 sm:$0xff]  }
  0xa5   : > { %1170 = vmatpush2.bf16.msra.mxu0 %v4274_v2  ;;  %v2807_v2 = vld [vmem:[%s4171_s1 + $0x594] ss:$16 sps:$4 sm:$0xff]  }
  0xa6   : > { %1232 = vmatpush1.bf16.msra.mxu1 %v4275_v3  ;;  %1171 = vmatprep.subr.bf16.mxu0 %v4276_v4  ;;  %v2802_v3 = vld [vmem:[%s4171_s1 + $0x390] ss:$16 sps:$4 sm:$0xff]  }
  0xa7   : > { %1233 = vmatprep.subr.bf16.mxu1 %v4277_v5  ;;  %v2805_v4 = vld [vmem:[%s4171_s1 + $0x590] ss:$16 sps:$4 sm:$0xff]   ;;  %v2810_v5 = vld [vmem:[%s4171_s1 + $0x374] ss:$16 sps:$4 sm:$0xff]  }
  0xa9   : > { %1172 = vmatpush2.bf16.msra.mxu0 %v4278_v6  ;;  %v2813_v6 = vld [vmem:[%s4171_s1 + $0x574] ss:$16 sps:$4 sm:$0xff]  }
  0xaa   : > { %1234 = vmatpush1.bf16.msra.mxu1 %v4279_v7  ;;  %1173 = vmatprep.subr.bf16.mxu0 %v4280_v8  ;;  %v2808_v7 = vld [vmem:[%s4171_s1 + $0x370] ss:$16 sps:$4 sm:$0xff]  }
  0xab   : > { %1235 = vmatprep.subr.bf16.mxu1 %v4281_v9  ;;  %v2811_v8 = vld [vmem:[%s4171_s1 + $0x570] ss:$16 sps:$4 sm:$0xff]   ;;  %v2816_v9 = vld [vmem:[%s4171_s1 + $0x354] ss:$16 sps:$4 sm:$0xff]  }
  0xad   : > { %1174 = vmatpush2.bf16.msra.mxu0 %v4282_v10  ;;  %v2819_v10 = vld [vmem:[%s4171_s1 + $0x554] ss:$16 sps:$4 sm:$0xff]  }
  0xae   : > { %1236 = vmatpush1.bf16.msra.mxu1 %v4283_v11  ;;  %1175 = vmatprep.subr.bf16.mxu0 %v4284_v12  ;;  %v2356_v11 = vld [vmem:[%s4171_s1 + $0x650] sm:$0x11] }
  0xaf   : > { %1237 = vmatprep.subr.bf16.mxu1 %v4285_v13  ;;  %v2814_v12 = vld [vmem:[%s4171_s1 + $0x350] ss:$16 sps:$4 sm:$0xff]  }
  0xb0   : > { %v2817_v13 = vld [vmem:[%s4171_s1 + $0x550] ss:$16 sps:$4 sm:$0xff]  }
  0xb1   : > { %1176 = vmatpush2.bf16.msra.mxu0 %v4286_v14  ;;  %v2822_v14 = vld [vmem:[%s4171_s1 + $0x334] ss:$16 sps:$4 sm:$0xff]  }
  0xb2   : > { %1238 = vmatpush1.bf16.msra.mxu1 %v4287_v15  ;;  %1268 = vmatprep.subr.bf16.mxu0 %v4289_v17  ;;  %v2825_v15 = vld [vmem:[%s4171_s1 + $0x534] ss:$16 sps:$4 sm:$0xff]  }
  0xb3   : > { %1239 = vmatprep.subr.bf16.mxu1 %v4288_v16  ;;  %v2567_v16 = vcombine.high %v2356_v11, %v2356_v11 }
  0xb4   : > { %1178 = vmatmul.mubr.bf16.vlgmr.msra.gmra.mxu0 %v4290_v18 }
  0xb5   : > { %1269 = vmatpush1.bf16.msra.mxu0 %v4292_v20  ;;  %2465 = vmatprep.mubr.msk.bf16.mxu0 %vm959_vm1, %v3191_v35  ;;  %v2823_v20 = vld [vmem:[%s4171_s1 + $0x530] ss:$16 sps:$4 sm:$0xff]  }
  0xb6   : > { %1240 = vmatpush1.bf16.msra.mxu1 %v4291_v19  ;;  %1270 = vmatprep.subr.bf16.mxu0 %v4294_v22  ;;  %v2820_v19 = vld [vmem:[%s4171_s1 + $0x330] ss:$16 sps:$4 sm:$0xff]  }
  0xb7   : > { %1241 = vmatprep.subr.bf16.mxu1 %v4293_v21  ;;  %v2566_v21 = vcombine.low %v2356_v11, %v2356_v11  ;;  %v2890_v11 = vld [vmem:[%s4171_s1 + $0x5dc] ss:$16 sps:$4 sm:$0xff]  }
  0xb9   : > { %1271 = vmatpush1.bf16.msra.mxu0 %v4296_v24  ;;  %v4318_v24 = vld [vmem:[#allocation2_spill] sm:$0xff] }
  0xba   : > { %1242 = vmatpush1.bf16.msra.mxu1 %v4295_v23  ;;  %1272 = vmatprep.subr.bf16.mxu0 %v4298_v27  ;;  %v2828_v23 = vld [vmem:[%s4171_s1 + $0x514] ss:$16 sps:$4 sm:$0xff]  }
  0xbb   : > { %1243 = vmatprep.subr.bf16.mxu1 %v4297_v25  ;;  %v1823_v25 = vand.u32 %v2567_v16, %v4318_v24  ;;  %v2894_v16 = vld [vmem:[%s4171_s1 + $0x5b8] ss:$16 sps:$4 sm:$0xff]  }
  0xbd   : > { %1273 = vmatpush1.bf16.msra.mxu0 %v4299_v28  ;;  %v2826_v28 = vld [vmem:[%s4171_s1 + $0x510] ss:$16 sps:$4 sm:$0xff]  }
  0xbe   : > { %1244 = vmatpush2.bf16.msra.mxu1 %v3479_v36  ;;  %1274 = vmatprep.subr.bf16.mxu0 %v4301_v30  ;;  %v2781_v36 = vld [vmem:[%s4171_s1 + $0x610] ss:$16 sps:$4 sm:$0xff]  }
  0xbf   : > { %1245 = vmatprep.subr.bf16.mxu1 %v4300_v29  ;;  %v1820_v29 = vand.u32 %v2566_v21, %v4318_v24  ;;  %v2900_v21 = vld [vmem:[%s4171_s1 + $0x598] ss:$16 sps:$4 sm:$0xff]  }
  0xc1   : > { %1275 = vmatpush1.bf16.msra.mxu0 %v4303_v38  ;;  %v2836_v38 = vld [vmem:[%s4171_s1 + $0x634] ss:$16 sps:$4 sm:$0xff]  }
  0xc2   : > { %1246 = vmatpush2.bf16.msra.mxu1 %v4302_v37  ;;  %1276 = vmatprep.subr.bf16.mxu0 %v4305_v43  ;;  %v2833_v37 = vld [vmem:[%s4171_s1 + $0x4f4] ss:$16 sps:$4 sm:$0xff]   ;;  %v2834_v43 = vld [vmem:[%s4171_s1 + $0x630] ss:$16 sps:$4 sm:$0xff]  }
  0xc3   : > { %1247 = vmatprep.subr.bf16.mxu1 %v4304_v42  ;;  %v2831_v42 = vld [vmem:[%s4171_s1 + $0x4f0] ss:$16 sps:$4 sm:$0xff]  }
  0xc5   : > { %1277 = vmatpush1.bf16.msra.mxu0 %v4307_v47  ;;  %v2842_v47 = vld [vmem:[%s4171_s1 + $0x41c] ss:$16 sps:$4 sm:$0xff]  }
  0xc6   : > { %1248 = vmatpush2.bf16.msra.mxu1 %v4306_v46  ;;  %1278 = vmatprep.subr.bf16.mxu0 %v4309_v50  ;;  %v2839_v46 = vld [vmem:[%s4171_s1 + $0x4d4] ss:$16 sps:$4 sm:$0xff]   ;;  %v2840_v50 = vld [vmem:[%s4171_s1 + $0x418] ss:$16 sps:$4 sm:$0xff]  }
  0xc7   : > { %1249 = vmatprep.subr.bf16.mxu1 %v4308_v49  ;;  %v2837_v49 = vld [vmem:[%s4171_s1 + $0x4d0] ss:$16 sps:$4 sm:$0xff]  }
  0xc9   : > { %1279 = vmatpush1.bf16.msra.mxu0 %v4311_v53  ;;  %v2848_v53 = vld [vmem:[%s4171_s1 + $0x3fc] ss:$16 sps:$4 sm:$0xff]  }
  0xca   : > { %1250 = vmatpush2.bf16.msra.mxu1 %v4310_v52  ;;  %1280 = vmatprep.subr.bf16.mxu0 %v4313_v55  ;;  %v2845_v52 = vld [vmem:[%s4171_s1 + $0x4b4] ss:$16 sps:$4 sm:$0xff]   ;;  %v2846_v55 = vld [vmem:[%s4171_s1 + $0x3f8] ss:$16 sps:$4 sm:$0xff]  }
  0xcb   : > { %1251 = vmatprep.subr.bf16.mxu1 %v4312_v54  ;;  %v2843_v54 = vld [vmem:[%s4171_s1 + $0x4b0] ss:$16 sps:$4 sm:$0xff]  }
  0xcd   : > { %1281 = vmatpush1.bf16.msra.mxu0 %v4315_v57  ;;  %v2854_v57 = vld [vmem:[%s4171_s1 + $0x3dc] ss:$16 sps:$4 sm:$0xff]  }
  0xce   : > { %1252 = vmatpush2.bf16.msra.mxu1 %v4314_v56  ;;  %1282 = vmatprep.subr.bf16.mxu0 %v3599_v40  ;;  %v2792_v40 = vld [vmem:[%s4171_s1 + $0x3d4] ss:$16 sps:$4 sm:$0xff]  }
  0xcf   : > { %1253 = vmatprep.subr.bf16.mxu1 %v4316_v58  ;;  %v2851_v56 = vld [vmem:[%s4171_s1 + $0x494] ss:$16 sps:$4 sm:$0xff]   ;;  %v2849_v58 = vld [vmem:[%s4171_s1 + $0x490] ss:$16 sps:$4 sm:$0xff]  }
  0xd1   : > { %1283 = vmatpush1.bf16.msra.mxu0 %v4317_v59  ;;  %v2852_v59 = vld [vmem:[%s4171_s1 + $0x3d8] ss:$16 sps:$4 sm:$0xff]  }
  0xd2   : > { %1254 = vmatpush2.bf16.msra.mxu1 %v3606_v33  ;;  %1296 = vmatprep.subr.bf16.mxu0 %v3621_v51  ;;  %v2789_v51 = vld [vmem:[%s4171_s1 + $0x5f4] ss:$16 sps:$4 sm:$0xff]   ;;  %v2787_v33 = vld [vmem:[%s4171_s1 + $0x5f0] ss:$16 sps:$4 sm:$0xff]  }
  0xd3   : > { %1255 = vmatprep.subr.bf16.mxu1 %v3618_v32  ;;  %v2790_v32 = vld [vmem:[%s4171_s1 + $0x3d0] ss:$16 sps:$4 sm:$0xff]  }
  0xd5   : > { %1297 = vmatpush2.bf16.msra.mxu0 %v3631_v48  ;;  %v2793_v48 = vld [vmem:[%s4171_s1 + $0x5d0] ss:$16 sps:$4 sm:$0xff]  }
  0xd6   : > { %1256 = vmatpush2.bf16.msra.mxu1 %v3628_v39  ;;  %1298 = vmatprep.subr.bf16.mxu0 %v3643_v45  ;;  %v2786_v45 = vld [vmem:[%s4171_s1 + $0x3f4] ss:$16 sps:$4 sm:$0xff]  }
  0xd7   : > { %1257 = vmatprep.subr.bf16.mxu1 %v3638_v61  ;;  %v2798_v39 = vld [vmem:[%s4171_s1 + $0x3b4] ss:$16 sps:$4 sm:$0xff]  }
  0xd8   : > { %v2801_v61 = vld [vmem:[%s4171_s1 + $0x5b4] ss:$16 sps:$4 sm:$0xff]  }
  0xd9   : > { %1299 = vmatpush2.bf16.msra.mxu0 %v3655_v34  ;;  %v2784_v34 = vld [vmem:[%s4171_s1 + $0x3f0] ss:$16 sps:$4 sm:$0xff]  }
  0xda   : > { %1258 = vmatpush2.bf16.msra.mxu1 %v3650_v31  ;;  %1831 = vmatprep.subr.bf16.mxu0 %v2780_v60  ;;  %v2796_v31 = vld [vmem:[%s4171_s1 + $0x3b0] ss:$16 sps:$4 sm:$0xff]   ;;  %v2857_v60 = vld [vmem:[%s4171_s1 + $0x474] ss:$16 sps:$4 sm:$0xff]  }
  0xdb   : > { %1872 = vmatprep.subr.bf16.mxu1 %v2783_v62 }
  0xdc   : > { %1301 = vmatmul.mubr.bf16.vlgmr.msra.gmra.mxu0 %v3207_v41 }
  0xdd   : > { %1260 = vmatmul.mubr.bf16.vlgmr.msra.gmra.mxu1 %v4290_v18  ;;  %1832 = vmatpush1.bf16.msra.mxu0 %v2778_v26 }
  0xde   : > { %1873 = vmatpush1.bf16.msra.mxu1 %v2781_v36  ;;  %1833 = vmatprep.subr.bf16.mxu0 %v2786_v45  ;;  %v2855_v36 = vld [vmem:[%s4171_s1 + $0x470] ss:$16 sps:$4 sm:$0xff]   ;;  %v2858_v45 = vld [vmem:[%s4171_s1 + $0x3b8] ss:$16 sps:$4 sm:$0xff]  }
  0xdf   : > { %1874 = vmatprep.subr.bf16.mxu1 %v2789_v51  ;;  %2570 = vmatprep.mubr.msk.bf16.mxu1 %vm959_vm1, %v3191_v35 }
  0xe0   : > { %1863 = vmatprep.mubr.bf16.mxu0 %v3303_v63 }
  0xe1   : > { %1834 = vmatpush1.bf16.msra.mxu0 %v2784_v34  ;;  %v2863_v34 = vld [vmem:[%s4171_s1 + $0x454] ss:$16 sps:$4 sm:$0xff]  }
  0xe2   : > { %1875 = vmatpush1.bf16.msra.mxu1 %v2787_v33  ;;  %1835 = vmatprep.subr.bf16.mxu0 %v2792_v40  ;;  %v2866_v33 = vld [vmem:[%s4171_s1 + $0x39c] ss:$16 sps:$4 sm:$0xff]  }
  0xe3   : > { %1876 = vmatprep.subr.bf16.mxu1 %v2795_v44 }
  0xe5   : > { %1836 = vmatpush1.bf16.msra.mxu0 %v2790_v32  ;;  %v2861_v32 = vld [vmem:[%s4171_s1 + $0x450] ss:$16 sps:$4 sm:$0xff]  }
  0xe6   : > { %1877 = vmatpush1.bf16.msra.mxu1 %v2793_v48  ;;  %1837 = vmatprep.subr.bf16.mxu0 %v2798_v39  ;;  %v2864_v48 = vld [vmem:[%s4171_s1 + $0x398] ss:$16 sps:$4 sm:$0xff]  }
  0xe7   : > { %1878 = vmatprep.subr.bf16.mxu1 %v2801_v61  ;;  %v2869_v61 = vld [vmem:[%s4171_s1 + $0x434] ss:$16 sps:$4 sm:$0xff]  }
  0xe9   : > { %1838 = vmatpush1.bf16.msra.mxu0 %v2796_v31  ;;  %v2872_v31 = vld [vmem:[%s4171_s1 + $0x37c] ss:$16 sps:$4 sm:$0xff]  }
  0xea   : > { %1879 = vmatpush1.bf16.msra.mxu1 %v2799_v0  ;;  %1839 = vmatprep.subr.bf16.mxu0 %v2804_v1  ;;  %v2867_v0 = vld [vmem:[%s4171_s1 + $0x430] ss:$16 sps:$4 sm:$0xff]   ;;  %v2870_v1 = vld [vmem:[%s4171_s1 + $0x378] ss:$16 sps:$4 sm:$0xff]  }
  0xeb   : > { %1880 = vmatprep.subr.bf16.mxu1 %v2807_v2  ;;  %v2875_v2 = vld [vmem:[%s4171_s1 + $0x35c] ss:$16 sps:$4 sm:$0xff]  }
  0xed   : > { %1840 = vmatpush1.bf16.msra.mxu0 %v2802_v3  ;;  %v2878_v3 = vld [vmem:[%s4171_s1 + $0x61c] ss:$16 sps:$4 sm:$0xff]  }
  0xee   : > { %1881 = vmatpush1.bf16.msra.mxu1 %v2805_v4  ;;  %1841 = vmatprep.subr.bf16.mxu0 %v2810_v5  ;;  %v2873_v4 = vld [vmem:[%s4171_s1 + $0x358] ss:$16 sps:$4 sm:$0xff]  }
  0xef   : > { %1882 = vmatprep.subr.bf16.mxu1 %v2813_v6  ;;  %v2876_v5 = vld [vmem:[%s4171_s1 + $0x618] ss:$16 sps:$4 sm:$0xff]   ;;  %v2881_v6 = vld [vmem:[%s4171_s1 + $0x33c] ss:$16 sps:$4 sm:$0xff]  }
  0xf1   : > { %1842 = vmatpush1.bf16.msra.mxu0 %v2808_v7  ;;  %v2884_v7 = vld [vmem:[%s4171_s1 + $0x5fc] ss:$16 sps:$4 sm:$0xff]  }
  0xf2   : > { %1883 = vmatpush1.bf16.msra.mxu1 %v2811_v8  ;;  %1843 = vmatprep.subr.bf16.mxu0 %v2816_v9  ;;  %v2879_v8 = vld [vmem:[%s4171_s1 + $0x338] ss:$16 sps:$4 sm:$0xff]  }
  0xf3   : > { %1884 = vmatprep.subr.bf16.mxu1 %v2819_v10  ;;  %v2882_v9 = vld [vmem:[%s4171_s1 + $0x5f8] ss:$16 sps:$4 sm:$0xff]   ;;  %v2887_v10 = vld [vmem:[%s4171_s1 + $0x51c] ss:$16 sps:$4 sm:$0xff]  }
  0xf5   : > { %v1053_v17 = vpop.f32.mrf.mxu1  ;;  %1844 = vmatpush1.bf16.msra.mxu0 %v2814_v12  ;;  %v2885_v12 = vld [vmem:[%s4171_s1 + $0x518] ss:$16 sps:$4 sm:$0xff]  }
  0xf6   : > { %1885 = vmatpush1.bf16.msra.mxu1 %v2817_v13  ;;  %1845 = vmatprep.subr.bf16.mxu0 %v2822_v14  ;;  %v2888_v13 = vld [vmem:[%s4171_s1 + $0x5d8] ss:$16 sps:$4 sm:$0xff]   ;;  %v2893_v14 = vld [vmem:[%s4171_s1 + $0x4fc] ss:$16 sps:$4 sm:$0xff]  }
  0xf7   : > { %v1055_v22 = vpop.f32.mrf.mxu1  ;;  %1886 = vmatprep.subr.bf16.mxu1 %v2825_v15  ;;  %v2891_v15 = vld [vmem:[%s4171_s1 + $0x4f8] ss:$16 sps:$4 sm:$0xff]  }
  0xf9   : > { %v1057_v27 = vpop.f32.mrf.mxu1  ;;  %1846 = vmatpush1.bf16.msra.mxu0 %v2820_v19  ;;  %v2902_v19 = vld [vmem:[%s4171_s1 + $0x59c] ss:$16 sps:$4 sm:$0xff]  }
  0xfa   : > { %1887 = vmatpush1.bf16.msra.mxu1 %v2823_v20  ;;  %1847 = vmatprep.subr.bf16.mxu0 %v2828_v23  ;;  %v2897_v20 = vld [vmem:[%s4171_s1 + $0x4d8] ss:$16 sps:$4 sm:$0xff]   ;;  %v2908_v23 = vld [vmem:[%s4171_s1 + $0x57c] ss:$16 sps:$4 sm:$0xff]  }
  0xfb   : > { %v1058_v30 = vpop.f32.mrf.mxu1  ;;  %1900 = vmatprep.subr.bf16.mxu1 %v1823_v25  ;;  %v2903_v25 = vld [vmem:[%s4171_s1 + $0x4b8] ss:$16 sps:$4 sm:$0xff]  }
  0xfc   : > { %v2906_v27 = vld [vmem:[%s4171_s1 + $0x578] ss:$16 sps:$4 sm:$0xff]  }
  0xfd   : > { %1848 = vmatpush2.bf16.msra.mxu0 %v2826_v28  ;;  %v2911_v28 = vld [vmem:[%s4171_s1 + $0x49c] ss:$16 sps:$4 sm:$0xff]  }
  0xfe   : > { %1901 = vmatpush2.bf16.msra.mxu1 %v1820_v29  ;;  %1849 = vmatprep.subr.bf16.mxu0 %v2833_v37  ;;  %v2914_v29 = vld [vmem:[%s4171_s1 + $0x55c] ss:$16 sps:$4 sm:$0xff]   ;;  %v2909_v37 = vld [vmem:[%s4171_s1 + $0x498] ss:$16 sps:$4 sm:$0xff]  }
  0xff   : > { %1902 = vmatprep.subr.bf16.mxu1 %v2836_v38  ;;  %v2357_v30 = vld [vmem:[%s4171_s1 + $0x658] sm:$0x11] }
 0x100   : > { %v2912_v38 = vld [vmem:[%s4171_s1 + $0x558] ss:$16 sps:$4 sm:$0xff]  }
 0x101   : > { %1850 = vmatpush2.bf16.msra.mxu0 %v2831_v42  ;;  %v2917_v42 = vld [vmem:[%s4171_s1 + $0x47c] ss:$16 sps:$4 sm:$0xff]  }
 0x102   : > { %1903 = vmatpush2.bf16.msra.mxu1 %v2834_v43  ;;  %1851 = vmatprep.subr.bf16.mxu0 %v2839_v46  ;;  %v2920_v43 = vld [vmem:[%s4171_s1 + $0x53c] ss:$16 sps:$4 sm:$0xff]   ;;  %v2569_v46 = vcombine.high %v2357_v30, %v2357_v30 }
 0x103   : > { %1913 = vmatprep.subr.bf16.mxu1 %v2842_v47 }
 0x105   : > { %1905 = vmatmul.mubr.bf16.vlgmr.msra.gmra.mxu1 %v3207_v41  ;;  %1852 = vmatpush2.bf16.msra.mxu0 %v2837_v49 }
 0x106   : > { %1914 = vmatpush1.bf16.msra.mxu1 %v2840_v50  ;;  %1853 = vmatprep.subr.bf16.mxu0 %v2845_v52  ;;  %v2915_v52 = vld [vmem:[%s4171_s1 + $0x478] ss:$16 sps:$4 sm:$0xff]  }
 0x107   : > { %1915 = vmatprep.subr.bf16.mxu1 %v2848_v53  ;;  %1945 = vmatprep.mubr.bf16.mxu1 %v3303_v63  ;;  %v2860_v63 = vld [vmem:[%s4171_s1 + $0x3bc] ss:$16 sps:$4 sm:$0xff]   ;;  %v2918_v53 = vld [vmem:[%s4171_s1 + $0x538] ss:$16 sps:$4 sm:$0xff]  }
 0x109   : > { %1854 = vmatpush2.bf16.msra.mxu0 %v2843_v54  ;;  %v2568_v54 = vcombine.low %v2357_v30, %v2357_v30 }
 0x10a   : > { %1916 = vmatpush1.bf16.msra.mxu1 %v2846_v55  ;;  %1855 = vmatprep.subr.bf16.mxu0 %v2851_v56 }
 0x10b   : > { %1917 = vmatprep.subr.bf16.mxu1 %v2854_v57  ;;  %v2923_v57 = vld [vmem:[%s4171_s1 + $0x45c] ss:$16 sps:$4 sm:$0xff]  }
 0x10c   : > { %v1012_v62 = vpop.f32.mrf.mxu0 }
 0x10d   : > { %v3943_v26 = vadd.f32 %v1053_v17, %v1012_v62  ;;  %1856 = vmatpush2.bf16.msra.mxu0 %v2849_v58  ;;  %v2899_v17 = vld [vmem:[%s4171_s1 + $0x4dc] ss:$16 sps:$4 sm:$0xff]   ;;  %v1829_v58 = vand.u32 %v2569_v46, %v4318_v24  ;;  %v2921_v62 = vld [vmem:[%s4171_s1 + $0x458] ss:$16 sps:$4 sm:$0xff]  }
 0x10e   : > { %1918 = vmatpush1.bf16.msra.mxu1 %v2852_v59  ;;  %v1014_v51 = vpop.f32.mrf.mxu0  ;;  %1857 = vmatprep.subr.bf16.mxu0 %v2857_v60 }
 0x10f   : > { %1919 = vmatprep.subr.bf16.mxu1 %v2860_v63  ;;  %v3957_v40 = vadd.f32 %v1055_v22, %v1014_v51  ;;  %v2905_v22 = vld [vmem:[%s4171_s1 + $0x4bc] ss:$16 sps:$4 sm:$0xff]  }
 0x110   : > { %v1016_v44 = vpop.f32.mrf.mxu0 }
 0x111   : > { %1858 = vmatpush2.bf16.msra.mxu0 %v2855_v36  ;;  %v1826_v36 = vand.u32 %v2568_v54, %v4318_v24  ;;  %v2926_v44 = vld [vmem:[%s4171_s1 + $0x438] ss:$16 sps:$4 sm:$0xff]  }
 0x112   : > { %1920 = vmatpush1.bf16.msra.mxu1 %v2858_v45  ;;  %v1017_v39 = vpop.f32.mrf.mxu0  ;;  %1859 = vmatprep.subr.bf16.mxu0 %v2863_v34  ;;  %v2928_v34 = vld [vmem:[%s4171_s1 + $0x43c] ss:$16 sps:$4 sm:$0xff]   ;;  %v2929_v24 = vld [vmem:[%s4171_s1 + $0x638] ss:$16 sps:$4 sm:$0xff]  }
 0x113   : > { %1921 = vmatprep.subr.bf16.mxu1 %v2866_v33  ;;  %v2931_v33 = vld [vmem:[%s4171_s1 + $0x63c] ss:$16 sps:$4 sm:$0xff]  }
 0x115   : > { %1860 = vmatpush2.bf16.msra.mxu0 %v2861_v32 }
 0x116   : > { %1922 = vmatpush1.bf16.msra.mxu1 %v2864_v48  ;;  %1861 = vmatprep.subr.bf16.mxu0 %v2869_v61 }
 0x117   : > { %1923 = vmatprep.subr.bf16.mxu1 %v2872_v31  ;;  %v2932_v31 = vld [vmem:[%s4172_s2 + $0x78] sm:$0xff]  }
 0x119   : > { %1862 = vmatpush2.bf16.msra.mxu0 %v2867_v0  ;;  %v2933_v0 = vld [vmem:[%s4172_s2 + $0x38] sm:$0xff]  }
 0x11a   : > { %1924 = vmatpush1.bf16.msra.mxu1 %v2870_v1  ;;  %1954 = vmatprep.subr.bf16.mxu0 %v2878_v3  ;;  %v2934_v1 = vld [vmem:[%s4172_s2 + $0x70] sm:$0xff]   ;;  %v2938_v3 = vld [vmem:[%s4172_s2 + $0x60] sm:$0xff]  }
 0x11b   : > { %1925 = vmatprep.subr.bf16.mxu1 %v2875_v2  ;;  %v2937_v2 = vld [vmem:[%s4172_s2 + $0x28] sm:$0xff]  }
 0x11c   : > { %1864 = vmatmul.mubr.bf16.vlgmr.msra.gmra.mxu0 %v4290_v18 }
 0x11d   : > { %1955 = vmatpush1.bf16.msra.mxu0 %v2876_v5  ;;  %2571 = vmatprep.mubr.msk.bf16.mxu0 %vm959_vm1, %v3191_v35  ;;  %v2896_v35 = vld [vmem:[%s4171_s1 + $0x5bc] ss:$16 sps:$4 sm:$0xff]  }
 0x11e   : > { %1926 = vmatpush1.bf16.msra.mxu1 %v2873_v4  ;;  %1956 = vmatprep.subr.bf16.mxu0 %v2884_v7  ;;  %v2939_v4 = vld [vmem:[%s4172_s2 + $0x20] sm:$0xff]   ;;  %v2940_v5 = vld [vmem:[%s4172_s2 + $0x58] sm:$0xff]  }
 0x11f   : > { %1927 = vmatprep.subr.bf16.mxu1 %v2881_v6  ;;  %v2941_v6 = vld [vmem:[%s4172_s2 + $0x18] sm:$0xff]  }
 0x121   : > { %1957 = vmatpush1.bf16.msra.mxu0 %v2882_v9 }
 0x122   : > { %1928 = vmatpush1.bf16.msra.mxu1 %v2879_v8  ;;  %1958 = vmatprep.subr.bf16.mxu0 %v2890_v11 }
 0x123   : > { %1929 = vmatprep.subr.bf16.mxu1 %v2887_v10 }
 0x125   : > { %1959 = vmatpush1.bf16.msra.mxu0 %v2888_v13 }
 0x126   : > { %1930 = vmatpush2.bf16.msra.mxu1 %v2885_v12  ;;  %1960 = vmatprep.subr.bf16.mxu0 %v2896_v35  ;;  %v2942_v35 = vld [vmem:[%s4172_s2 + $0x50] sm:$0xff]  }
 0x127   : > { %1931 = vmatprep.subr.bf16.mxu1 %v2893_v14 }
 0x129   : > { %1961 = vmatpush1.bf16.msra.mxu0 %v2894_v16  ;;  %v2946_v16 = vld [vmem:[%s4172_s2 + $0x40] sm:$0xff]  }
 0x12a   : > { %1932 = vmatpush2.bf16.msra.mxu1 %v2891_v15  ;;  %1962 = vmatprep.subr.bf16.mxu0 %v2902_v19  ;;  %v2943_v15 = vld [vmem:[%s4172_s2 + $0x10] sm:$0xff]  }
 0x12b   : > { %1933 = vmatprep.subr.bf16.mxu1 %v2899_v17  ;;  %v2947_v17 = vld [vmem:[%s4172_s2] sm:$0xff]  }
 0x12d   : > { %1963 = vmatpush1.bf16.msra.mxu0 %v2900_v21 }
 0x12e   : > { %1934 = vmatpush2.bf16.msra.mxu1 %v2897_v20  ;;  %1964 = vmatprep.subr.bf16.mxu0 %v2908_v23 }
 0x12f   : > { %1935 = vmatprep.subr.bf16.mxu1 %v2905_v22 }
 0x131   : > { %1965 = vmatpush1.bf16.msra.mxu0 %v2906_v27 }
 0x132   : > { %1936 = vmatpush2.bf16.msra.mxu1 %v2903_v25  ;;  %1966 = vmatprep.subr.bf16.mxu0 %v2914_v29 }
 0x133   : > { %1937 = vmatprep.subr.bf16.mxu1 %v2911_v28 }
 0x134   : > { %v1135_v49 = vpop.f32.mrf.mxu0 }
 0x135   : > { %v1094_v47 = vpop.f32.mrf.mxu1  ;;  %1967 = vmatpush1.bf16.msra.mxu0 %v2912_v38 }
 0x136   : > { %v4073_v50 = vadd.f32 %v1135_v49, %v1094_v47  ;;  %1938 = vmatpush2.bf16.msra.mxu1 %v2909_v37  ;;  %v1137_v56 = vpop.f32.mrf.mxu0  ;;  %1968 = vmatprep.subr.bf16.mxu0 %v2920_v43 }
 0x137   : > { %v1096_v55 = vpop.f32.mrf.mxu1  ;;  %1939 = vmatprep.subr.bf16.mxu1 %v2917_v42 }
 0x138   : > { %v4085_v59 = vadd.f32 %v1137_v56, %v1096_v55  ;;  %v1139_v63 = vpop.f32.mrf.mxu0 }
 0x139   : > { %v1098_v60 = vpop.f32.mrf.mxu1  ;;  %1969 = vmatpush1.bf16.msra.mxu0 %v2918_v53 }
 0x13a   : > { %1940 = vmatpush2.bf16.msra.mxu1 %v2915_v52  ;;  %v1140_v51 = vpop.f32.mrf.mxu0  ;;  %1982 = vmatprep.subr.bf16.mxu0 %v1829_v58 }
 0x13b   : > { %v1099_v45 = vpop.f32.mrf.mxu1  ;;  %1941 = vmatprep.subr.bf16.mxu1 %v2923_v57 }
 0x13d   : > { %1983 = vmatpush2.bf16.msra.mxu0 %v1826_v36 }
 0x13e   : > { %1942 = vmatpush2.bf16.msra.mxu1 %v2921_v62  ;;  %1984 = vmatprep.subr.bf16.mxu0 %v2931_v33 }
 0x13f   : > { %1943 = vmatprep.subr.bf16.mxu1 %v2928_v34 }
 0x141   : > { %1985 = vmatpush2.bf16.msra.mxu0 %v2929_v24 }
 0x142   : > { %1944 = vmatpush2.bf16.msra.mxu1 %v2926_v44  ;;  %2593 = vmatprep.subr.bf16.mxu0 %v2932_v31 }
 0x144   : > { %1987 = vmatmul.mubr.bf16.vlgmr.msra.gmra.mxu0 %v3207_v41  ;;  %v2935_v41 = vld [vmem:[%s4172_s2 + $0x30] sm:$0xff]  }
 0x145   : > { %1946 = vmatmul.mubr.bf16.vlgmr.msra.gmra.mxu1 %v4290_v18  ;;  %2594 = vmatpush3.bf16.msra.mxu0 %v2933_v0  ;;  %v2936_v18 = vld [vmem:[%s4172_s2 + $0x68] sm:$0xff]  }
 0x146   : > { %2595 = vmatprep.subr.bf16.mxu0 %v2934_v1 }
 0x149   : > { %2596 = vmatpush3.bf16.msra.mxu0 %v2935_v41 }
 0x14a   : > { %2597 = vmatprep.subr.bf16.mxu0 %v2936_v18 }
 0x14d   : > { %2598 = vmatpush3.bf16.msra.mxu0 %v2937_v2 }
 0x14e   : > { %2599 = vmatprep.subr.bf16.mxu0 %v2938_v3 }
 0x151   : > { %2600 = vmatpush3.bf16.msra.mxu0 %v2939_v4 }
 0x152   : > { %2601 = vmatprep.subr.bf16.mxu0 %v2940_v5 }
 0x155   : > { %2602 = vmatpush3.bf16.msra.mxu0 %v2941_v6 }
 0x156   : > { %2603 = vmatprep.subr.bf16.mxu0 %v2942_v35 }
 0x159   : > { %2604 = vmatpush3.bf16.msra.mxu0 %v2943_v15 }
 0x15d   : > { %v1220_v32 = vpop.f32.mrf.mxu1 }
 0x15f   : > { %v1222_v48 = vpop.f32.mrf.mxu1 }
 0x161   : > { %v1224_v39 = vpop.f32.mrf.mxu1 }
 0x163   : > { %v1225_v61 = vpop.f32.mrf.mxu1 }
 0x174   : > { %v1179_v7 = vpop.f32.mrf.mxu0 }
 0x175   : > { %v1180_v8 = vadd.f32 %v1179_v7, %v3943_v26  ;;  %v2944_v26 = vld [vmem:[%s4172_s2 + $0x48] sm:$0xff]  }
 0x176   : > { %v1181_v9 = vpop.f32.mrf.mxu0  ;;  %2605 = vmatprep.subr.bf16.mxu0 %v2944_v26 }
 0x177   : > { %v1221_v10 = vadd.f32 %v1220_v32, %v1180_v8  ;;  %v1182_v11 = vadd.f32 %v1181_v9, %v3957_v40  ;;  %v2945_v40 = vld [vmem:[%s4172_s2 + $0x8] sm:$0xff]   ;;  %v2588_v8 = vld [vmem:[%s4173_s3] ss:$0 sm:$0xff] }
 0x178   : > { %v1183_v12 = vpop.f32.mrf.mxu0  ;;  %2606 = vmatpush3.bf16.msra.mxu0 %v2945_v40 }
 0x179   : > { %v1223_v13 = vadd.f32 %v1222_v48, %v1182_v11  ;;  %2607 = vmatprep.subr.bf16.mxu0 %v2946_v16 }
 0x17a   : > { %v1184_v14 = vpop.f32.mrf.mxu0 }
 0x17c   : > { %2608 = vmatpush3.bf16.msra.mxu0 %v2947_v17 }
 0x19c   : > { %v1302_v20 = vpop.f32.mrf.mxu0 }
 0x19d   : > { %v1261_v19 = vpop.f32.mrf.mxu1 }
 0x19e   : > { %v1262_v21 = vadd.f32 %v1261_v19, %v4073_v50  ;;  %v1304_v23 = vpop.f32.mrf.mxu0 }
 0x19f   : > { %v1263_v22 = vpop.f32.mrf.mxu1 }
 0x1a0   : > { %v1303_v25 = vadd.f32 %v1302_v20, %v1262_v21  ;;  %v1264_v27 = vadd.f32 %v1263_v22, %v4085_v59  ;;  %v1306_v29 = vpop.f32.mrf.mxu0 }
 0x1a1   : > { %v1265_v28 = vpop.f32.mrf.mxu1 }
 0x1a2   : > { %v1305_v30 = vadd.f32 %v1304_v23, %v1264_v27  ;;  %v1307_v38 = vpop.f32.mrf.mxu0 }
 0x1a3   : > { %v1266_v37 = vpop.f32.mrf.mxu1 }
 0x1c5   : > { %v1906_v42 = vpop.f32.mrf.mxu1 }
 0x1c7   : > { %v1908_v43 = vpop.f32.mrf.mxu1 }
 0x1c9   : > { %v1910_v46 = vpop.f32.mrf.mxu1 }
 0x1cb   : > { %v1911_v47 = vpop.f32.mrf.mxu1 }
 0x1dc   : > { %v1865_v49 = vpop.f32.mrf.mxu0 }
 0x1dd   : > { %v1907_v52 = vadd.f32 %v1906_v42, %v1865_v49 }
 0x1de   : > { %v1867_v53 = vpop.f32.mrf.mxu0 }
 0x1df   : > { %v1995_v54 = vadd.f32 %v1907_v52, %v1221_v10  ;;  %v1909_v55 = vadd.f32 %v1908_v43, %v1867_v53  ;;  %v2589_v10 = vld [vmem:[%s4174_s4] ss:$0 sm:$0xff] }
 0x1e0   : > { %v1869_v50 = vpop.f32.mrf.mxu0 }
 0x1e1   : > { %v1996_v56 = vadd.f32 %v1909_v55, %v1223_v13  ;;  %v1999_v33 = vmul.f32 %v1995_v54, %v1995_v54 }
 0x1e2   : > { %v1870_v57 = vpop.f32.mrf.mxu0 }
 0x1e3   : > { %v2000_v39 = vmul.f32 %v1996_v56, %v1996_v56 }
 0x204   : > { %v1988_v60 = vpop.f32.mrf.mxu0 }
 0x205   : > { %v1947_v58 = vpop.f32.mrf.mxu1 }
 0x206   : > { %v1989_v59 = vadd.f32 %v1988_v60, %v1947_v58  ;;  %v1990_v62 = vpop.f32.mrf.mxu0 }
 0x207   : > { %v1949_v63 = vpop.f32.mrf.mxu1 }
 0x208   : > { %v1997_v36 = vadd.f32 %v1989_v59, %v1303_v25  ;;  %v1991_v45 = vadd.f32 %v1990_v62, %v1949_v63  ;;  %v1992_v34 = vpop.f32.mrf.mxu0 }
 0x209   : > { %v1951_v51 = vpop.f32.mrf.mxu1 }
 0x20a   : > { %v2001_v44 = vmul.f32 %v1997_v36, %v1997_v36  ;;  %v1998_v24 = vadd.f32 %v1991_v45, %v1305_v30  ;;  %v1993_v48 = vpop.f32.mrf.mxu0 }
 0x20b   : > { %v1952_v32 = vpop.f32.mrf.mxu1 }
 0x20c   : > { %v2003_v61 = vadd.f32 %v2001_v44, %v1999_v33  ;;  %v2002_v31 = vmul.f32 %v1998_v24, %v1998_v24 }
 0x20e   : > { %v2004_v0 = vadd.f32 %v2002_v31, %v2000_v39  ;;  %v2005_v41 = vpack.c.bf16 %v2003_v61, %v2003_v61 }
 0x210   : > { %v2006_v1 = vpack.c.bf16 %v2004_v0, %v2004_v0 }
 0x212   : > { %2167 = vmatprep.mubr.bf16.mxu0 %v2006_v1 }
 0x213   : > { %2168 = vmatmul.mubr.bf16.vlgmr.msra.gmra.mxu0 %v2005_v41 }
 0x2d3   : > { %v2609_v18 = vpop.f32.mrf.mxu0 }
 0x2d5   : > { %v2610_v2 = vpop.f32.mrf.mxu0 }
 0x2d6   : > { %v2611_v3 = vadd.f32 %v2610_v2, %v2609_v18 }
 0x2d7   : > { %v2612_v4 = vpop.f32.mrf.mxu0 }
 0x2d8   : > { %v2175_v5 = vmax.f32 %v2611_v3, 1e-05 }
 0x2d9   : > { %v2613_v6 = vpop.f32.mrf.mxu0 }
 0x2da   : > { %2948 = vlog2.f32 %v2175_v5 }
 0x2e7   : > { %v2949_v7 = vpop.eup %2948 }
 0x2e8   : > { %v2177_v9 = vmul.f32 0.6931472, %v2949_v7 }
 0x2ea   : > { %v2185_v11 = vsub.f32 %v2177_v9, %v2588_v8 }
 0x2ec   : > { %v2193_v12 = vmul.f32 %v2589_v10, %v2185_v11 }
 0x2ee   : > { %2194 = vst [vmem:[%s222_s11] sm:$0xff] %v2193_v12 }
 0x2ef PF: > { %s15_s18 = sadd.s32 1, %s2956_s18  }
 0x2f0   : > { %p12_p4 = scmp.ge.s32.totalorder %s15_s18, 4  }
 0x2f2   :  { %14 = sbr.rel (!%p12_p4) target bundleno = 1 (0x1), region = 71 }

</bundles_post_ra>
